<compile_context>
chip_gen: v7x
topology: tpu7x:2x2x1
jax: 0.10.0
libtpu: 0.0.40
codegen_flags: <defaults>
</compile_context>

<pallas_src>
import numpy as np
import jax
import jax.numpy as jnp
from jax.experimental import pallas as pl
from jax.experimental.pallas import tpu as pltpu

# ----- hyperparameters (small, consistent with the module) -----
B = 2            # batch
C = 4            # h.dense_channel
T = 16           # time frames  (conv H axis)
F = 8            # freq bins entering MaskDecoder (conv W axis)
DEPTH = 4        # h.mdepth
FOUT = 2 * F + 1 # after ConvTranspose2d((1,3), stride (1,2)); == h.n_fft//2 + 1
BETA = 2.0       # h.beta
EPS = 1e-5

BT = B * T       # 32  matmul row dim (batch packed into rows)
CF = C * F       # 32  lanes per skip slot
LANE = 128       # lane-dense width (4 slots * CF)

# ----- parameter-slab row layout (all blocks 8-row aligned) -----
ROWS_M = 3 * LANE                   # 384 rows per layer (3 taps x 128 input lanes)
OFF_M  = 0                          # conv matrices           [DEPTH * 384, 128]
OFF_W  = OFF_M + DEPTH * ROWS_M     # 1536  Weff (ConvT+1x1)  [128, 128]
OFF_QF = OFF_W + LANE               # 1664  Q_F lane averaging [128, 128]
OFF_QH = OFF_QF + LANE              # 1792  Q_H head averaging [128, 128]
OFF_PT = OFF_QH + LANE              # 1920  P_T row averaging  [32, 32] (lanes 0..31)
OFF_S  = OFF_PT + BT                # 1952  shift matrices     [DEPTH * 64, 32] (lanes 0..31)
OFF_DP = OFF_S + DEPTH * 2 * BT     # 2208  dense per-layer params, 4 rows/layer
OFF_HP = OFF_DP + 4 * DEPTH         # 2224  mask-head params, 6 rows (+2 pad)
NROWS  = OFF_HP + 8                 # 2232


# ---------------------------------------------------------------------------
# The single fused Pallas kernel.  Row layout: r = b*T + t.  Lane layout of the
# skip buffer: lane = slot*CF + c*F + f  (slot 0 = x, slot k = y_{k-1}).
# ---------------------------------------------------------------------------
def _fused_kernel(x_ref, p_ref, o_ref):
    f32 = jnp.float32
    dot = lambda a, b: jnp.dot(a, b, preferred_element_type=f32)

    pt = p_ref[OFF_PT:OFF_PT + BT, 0:BT]          # [32, 32]  within-batch time averaging (1/T)
    qf = p_ref[OFF_QF:OFF_QF + LANE, :]           # [128,128] per-channel lane averaging (1/F)

    skip = x_ref[...]                             # [32, 128] : x in lanes 0..31, rest zero
    y = skip
    for i in range(DEPTH):
        m_i = p_ref[OFF_M + i * ROWS_M:OFF_M + (i + 1) * ROWS_M, :]      # [384, 128]
        s_i = p_ref[OFF_S + i * 2 * BT:OFF_S + (i + 1) * 2 * BT, 0:BT]   # [64, 32]  (-d ; +d)
        r0 = OFF_DP + 4 * i
        bias_r  = p_ref[r0 + 0:r0 + 1, :]          # conv bias   (at this layer's output slot)
        gamma_r = p_ref[r0 + 1:r0 + 2, :]          # IN weight
        betab_r = p_ref[r0 + 2:r0 + 3, :]          # IN bias
        alpha_r = p_ref[r0 + 3:r0 + 4, :]          # PReLU slope

        # time-shifted (and edge-masked) copies of the whole 128-lane skip, one small matmul
        sh = dot(s_i, skip)                                              # [64, 128]
        xs = jnp.concatenate([skip, sh[0:BT, :], sh[BT:2 * BT, :]], axis=1)   # [32, 384]

        # dilated 3x3 conv: single fused matmul (freq taps + slot mapping folded into m_i)
        y = dot(xs, m_i) + bias_r                                        # [32, 128]

        # InstanceNorm2d(affine) + PReLU, all (batch, channel) blocks at once via matmuls
        mean = dot(dot(pt, y), qf)
        dev = y - mean
        var = dot(dot(pt, dev * dev), qf)
        y = dev * jax.lax.rsqrt(var + EPS)
        y = y * gamma_r + betab_r
        y = jnp.where(y >= 0.0, y, alpha_r * y)
        if i + 1 < DEPTH:
            skip = skip + y        # y is nonzero only in its (still zero) destination slot lanes

    # ----- mask head: ConvT(1,3)/(1,2) + 1x1 folded into Weff, IN(1) + PReLU + 1x1 + lsigmoid
    weff = p_ref[OFF_W:OFF_W + LANE, :]           # [128, 128] (rows 0..31 = last layer lanes)
    qh   = p_ref[OFF_QH:OFF_QH + LANE, :]         # [128, 128] (rows < FOUT -> 1/FOUT)
    ub   = p_ref[OFF_HP + 0:OFF_HP + 1, :]        # folded ConvT/1x1 bias (lanes < FOUT)
    g2_r = p_ref[OFF_HP + 1:OFF_HP + 2, :]        # IN(1) weight
    b2_r = p_ref[OFF_HP + 2:OFF_HP + 3, :]        # IN(1) bias
    a2_r = p_ref[OFF_HP + 3:OFF_HP + 4, :]        # PReLU(1)
    sw_r = p_ref[OFF_HP + 4:OFF_HP + 5, :]        # slope * w2   (final 1x1 folded into lsigmoid)
    sb_r = p_ref[OFF_HP + 5:OFF_HP + 6, :]        # slope * b2

    u = dot(y, weff) + ub                         # [32, 128], lanes >= FOUT stay 0
    mh = dot(dot(pt, u), qh)
    dv = u - mh
    vh = dot(dot(pt, dv * dv), qh)
    un = dv * jax.lax.rsqrt(vh + EPS)
    un = un * g2_r + b2_r
    un = jnp.where(un >= 0.0, un, a2_r * un)
    s = un * sw_r + sb_r
    o_ref[...] = BETA * pl.reciprocal(1.0 + jnp.exp(-s), approx=True)    # LearnableSigmoid_2d


def _mask_decoder_call(xpad, slab):
    return pl.pallas_call(
        _fused_kernel,
        out_shape=jax.ShapeDtypeStruct((BT, LANE), jnp.float32),
        grid_spec=pltpu.PrefetchScalarGridSpec(
            num_scalar_prefetch=0,
            grid=(1,),
            in_specs=[
                pl.BlockSpec((BT, LANE), lambda i: (0, 0)),      # lane-padded input rows
                pl.BlockSpec((NROWS, LANE), lambda i: (0, 0)),   # single lane-dense param slab
            ],
            out_specs=pl.BlockSpec((BT, LANE), lambda i: (0, 0)),
        ),
        compiler_params=pltpu.CompilerParams(dimension_semantics=("arbitrary",)),
    )(xpad, slab)


def mask_decoder_forward(x, params):
    # x: [B, C, T, F] (NCHW, same as the PyTorch module input)
    xr = jnp.transpose(x, (0, 2, 1, 3)).reshape(BT, CF)      # rows = (b, t), lanes = (c, f)
    xpad = jnp.pad(xr, ((0, 0), (0, LANE - CF)))             # lane-dense [32, 128]
    out = _mask_decoder_call(xpad, params["slab"])
    out = out.reshape(B, T, LANE)[:, :, :FOUT]
    return out[:, None, :, :]                                # [B, 1, T, FOUT]


# ---------------------------------------------------------------------------
# Deterministic parameter init (shapes from the module __init__) + host-side
# packing of the single [NROWS, 128] parameter slab.
# ---------------------------------------------------------------------------
def init_params(key):
    keys = jax.random.split(key, 40)
    ki = iter(range(40))

    dense = []
    for i in range(DEPTH):
        cin = C * (i + 1)
        W = 0.1 * jax.random.normal(keys[next(ki)], (C, cin, 3, 3), jnp.float32)
        bconv = 0.1 * jax.random.normal(keys[next(ki)], (C,), jnp.float32)
        g = 1.0 + 0.1 * jax.random.normal(keys[next(ki)], (C,), jnp.float32)   # IN weight
        bnb = 0.1 * jax.random.normal(keys[next(ki)], (C,), jnp.float32)       # IN bias
        a = 0.25 + 0.05 * jax.random.normal(keys[next(ki)], (C,), jnp.float32) # PReLU
        dense.append((W, bconv, g, bnb, a))

    wt = 0.1 * jax.random.normal(keys[next(ki)], (C, C, 1, 3), jnp.float32)   # ConvT [Cin,Cout,1,3]
    bt = 0.1 * jax.random.normal(keys[next(ki)], (C,), jnp.float32)
    w1 = 0.1 * jax.random.normal(keys[next(ki)], (1, C, 1, 1), jnp.float32)   # Conv2d(C,1,(1,1))
    b1 = jnp.float32(0.05)
    g2, bb2, a2 = jnp.float32(1.1), jnp.float32(0.05), jnp.float32(0.2)       # IN(1) + PReLU(1)
    w2, b2 = jnp.float32(0.7), jnp.float32(-0.1)                              # Conv2d(1,1,(1,1))
    slope = 1.0 + 0.1 * jax.random.normal(keys[next(ki)], (FOUT, 1), jnp.float32)

    params = {"dense": dense,
              "mask_raw": (wt, bt, w1, b1, g2, bb2, a2, w2, b2, slope)}

    slab = np.zeros((NROWS, LANE), np.float32)

    # (A) per-layer conv matrices, the 3 time taps stacked along rows, input channels mapped to
    #     the fixed skip-slot lanes, output mapped to the layer's destination slot lanes.
    kh_to_blk = {1: 0, 0: 1, 2: 2}      # xs order is [no-shift | -d | +d]
    for i in range(DEPTH):
        Wnp = np.asarray(dense[i][0])   # [C, C*(i+1), 3, 3]
        off_out = ((i + 1) % DEPTH) * CF
        base = OFF_M + i * ROWS_M
        for kh in range(3):
            blk = kh_to_blk[kh]
            for kw in range(3):
                for fo in range(F):
                    fi = fo + kw - 1
                    if not (0 <= fi < F):
                        continue
                    for o in range(C):
                        for cpt in range(C * (i + 1)):
                            gi, cc = cpt // C, cpt % C
                            slot_in = i - gi          # newest activation sits in the highest slot
                            row = base + blk * LANE + slot_in * CF + cc * F + fi
                            col = off_out + o * F + fo
                            slab[row, col] += Wnp[o, cpt, kh, kw]

    # (B) ConvTranspose2d((1,3),(1,2)) folded with the first 1x1 conv -> Weff
    wt_np = np.asarray(wt)
    w1v = np.asarray(w1)[0, :, 0, 0]
    for c in range(C):
        for f in range(F):
            for kk in range(3):
                slab[OFF_W + c * F + f, 2 * f + kk] = float(np.dot(w1v, wt_np[c, :, 0, kk]))
    beff = float(np.dot(w1v, np.asarray(bt))) + float(b1)

    # (C) Q_F: block-diagonal per-channel lane averaging (1/F) over all 4 slots
    lane = np.arange(LANE)
    blk_id = lane // F
    slab[OFF_QF:OFF_QF + LANE, :] = (blk_id[:, None] == blk_id[None, :]).astype(np.float32) / F

    # (D) Q_H: mask-head lane averaging (1/FOUT over the real lanes, broadcast to all lanes)
    slab[OFF_QH:OFF_QH + FOUT, :] = 1.0 / float(FOUT)

    # (E) P_T: block-diagonal within-batch time averaging (1/T)
    rows = np.arange(BT)
    bid = rows // T
    slab[OFF_PT:OFF_PT + BT, 0:BT] = (bid[:, None] == bid[None, :]).astype(np.float32) / T

    # (F) S matrices: [S_{-d}; S_{+d}] 0/1 row-selection = time shift + time/batch-edge validity
    tt = rows % T
    for i in range(DEPTH):
        d = 2 ** i
        base = OFF_S + i * 2 * BT
        for r in range(BT):
            if tt[r] - d >= 0:
                slab[base + r, r - d] = 1.0
            if tt[r] + d < T:
                slab[base + BT + r, r + d] = 1.0

    # (G) per-layer dense params placed at each layer's destination-slot lanes
    for i in range(DEPTH):
        _, bconv, g, bnb, a = dense[i]
        off_out = ((i + 1) % DEPTH) * CF
        r0 = OFF_DP + 4 * i
        sl = slice(off_out, off_out + CF)
        slab[r0 + 0, sl] = np.repeat(np.asarray(bconv), F)
        slab[r0 + 1, sl] = np.repeat(np.asarray(g), F)
        slab[r0 + 2, sl] = np.repeat(np.asarray(bnb), F)
        slab[r0 + 3, sl] = np.repeat(np.asarray(a), F)

    # (H) head params (active lanes 0..FOUT-1); final 1x1 conv folded into the slope rows
    sl = slice(0, FOUT)
    slope_v = np.asarray(slope)[:, 0]
    slab[OFF_HP + 0, sl] = beff
    slab[OFF_HP + 1, sl] = float(g2)
    slab[OFF_HP + 2, sl] = float(bb2)
    slab[OFF_HP + 3, sl] = float(a2)
    slab[OFF_HP + 4, sl] = slope_v * float(w2)
    slab[OFF_HP + 5, sl] = slope_v * float(b2)

    params["slab"] = jnp.asarray(slab)
    return params


# ---------------------------------------------------------------------------
# Pure-JAX reference (mirrors the PyTorch forward math) for validation
# ---------------------------------------------------------------------------
def ref_forward(x, params):
    HI = jax.lax.Precision.HIGHEST
    skip = x
    y = x
    for i in range(DEPTH):
        dil = 2 ** i
        W, bconv, g, bnb, a = params["dense"][i]
        xp = jnp.pad(skip, ((0, 0), (0, 0), (dil, dil), (1, 1)))
        y = jnp.zeros((B, C, T, F), jnp.float32)
        for kh in range(3):
            for kw in range(3):
                y = y + jnp.einsum("oc,bctf->botf", W[:, :, kh, kw],
                                   xp[:, :, kh * dil:kh * dil + T, kw:kw + F],
                                   precision=HI)
        y = y + bconv[None, :, None, None]
        mean = y.mean(axis=(2, 3), keepdims=True)
        var = ((y - mean) ** 2).mean(axis=(2, 3), keepdims=True)
        y = (y - mean) / jnp.sqrt(var + EPS)
        y = y * g[None, :, None, None] + bnb[None, :, None, None]
        y = jnp.where(y >= 0, y, a[None, :, None, None] * y)
        skip = jnp.concatenate([y, skip], axis=1)
    x = y

    wt, bt, w1, b1, g2, bb2, a2, w2, b2, slope = params["mask_raw"]
    z = jnp.zeros((B, C, T, FOUT), jnp.float32)
    for kk in range(3):
        contrib = jnp.einsum("co,bctf->botf", wt[:, :, 0, kk], x, precision=HI)
        z = z.at[:, :, :, kk:kk + 2 * F:2].add(contrib)
    z = z + bt[None, :, None, None]
    u = jnp.einsum("o,botf->btf", w1[0, :, 0, 0], z, precision=HI) + b1
    mean = u.mean(axis=(1, 2), keepdims=True)
    var = ((u - mean) ** 2).mean(axis=(1, 2), keepdims=True)
    u = (u - mean) / jnp.sqrt(var + EPS)
    u = u * g2 + bb2
    u = jnp.where(u >= 0, u, a2 * u)
    v = u * w2 + b2
    out = BETA * jax.nn.sigmoid(slope[:, 0][None, None, :] * v)
    return out[:, None, :, :]


if __name__ == "__main__":
    key = jax.random.PRNGKey(0)
    kx, kp = jax.random.split(key)
    x = jax.random.normal(kx, (B, C, T, F), jnp.float32)
    params = init_params(kp)

    fwd = jax.jit(mask_decoder_forward)
    out = jax.block_until_ready(fwd(x, params))
    assert out.shape == (B, 1, T, FOUT), out.shape

    ref = jax.block_until_ready(jax.jit(ref_forward)(x, params))
    # atol has ~1e-3 of headroom for the EUP approximate reciprocal in the sigmoid tail.
    np.testing.assert_allclose(np.asarray(out), np.asarray(ref), rtol=2e-3, atol=3e-3)
    print("KERNEL_OK")
</pallas_src>

<mosaic_0001>
module attributes {stable_mosaic.version = 11 : i64} {
  func.func @_fused_kernel(%arg0: i32, %arg1: memref<32x128xf32, #tpu.memory_space<vmem>>, %arg2: memref<2232x128xf32, #tpu.memory_space<vmem>>, %arg3: memref<32x128xf32, #tpu.memory_space<vmem>>) attributes {dimension_semantics = [#tpu.dimension_semantics<arbitrary>], iteration_bounds = array<i64: 1>, scalar_prefetch = 0 : i64, scratch_operands = 0 : i64, tpu.core_type = #tpu.core_type<tc>, window_params = [{pipeline_mode = #tpu.pipeline_mode<synchronous>, transform_indices = @transform_0, window_bounds = array<i64: 32, 128>}, {pipeline_mode = #tpu.pipeline_mode<synchronous>, transform_indices = @transform_1, window_bounds = array<i64: 2232, 128>}, {pipeline_mode = #tpu.pipeline_mode<synchronous>, transform_indices = @transform_2, window_bounds = array<i64: 32, 128>}]} {
    %c1920 = arith.constant 1920 : index
    %c0 = arith.constant 0 : index
    %0 = vector.load %arg2[%c1920, %c0] : memref<2232x128xf32, #tpu.memory_space<vmem>>, vector<32x32xf32>
    %c1664 = arith.constant 1664 : index
    %c0_0 = arith.constant 0 : index
    %1 = vector.load %arg2[%c1664, %c0_0] : memref<2232x128xf32, #tpu.memory_space<vmem>>, vector<128x128xf32>
    %c0_1 = arith.constant 0 : index
    %c0_2 = arith.constant 0 : index
    %2 = vector.load %arg1[%c0_1, %c0_2] : memref<32x128xf32, #tpu.memory_space<vmem>>, vector<32x128xf32>
    %c0_3 = arith.constant 0 : index
    %c0_4 = arith.constant 0 : index
    %3 = vector.load %arg2[%c0_3, %c0_4] : memref<2232x128xf32, #tpu.memory_space<vmem>>, vector<384x128xf32>
    %c1952 = arith.constant 1952 : index
    %c0_5 = arith.constant 0 : index
    %4 = vector.load %arg2[%c1952, %c0_5] : memref<2232x128xf32, #tpu.memory_space<vmem>>, vector<64x32xf32>
    %c2208 = arith.constant 2208 : index
    %c0_6 = arith.constant 0 : index
    %5 = vector.load %arg2[%c2208, %c0_6] : memref<2232x128xf32, #tpu.memory_space<vmem>>, vector<1x128xf32>
    %c2209 = arith.constant 2209 : index
    %c0_7 = arith.constant 0 : index
    %6 = vector.load %arg2[%c2209, %c0_7] : memref<2232x128xf32, #tpu.memory_space<vmem>>, vector<1x128xf32>
    %c2210 = arith.constant 2210 : index
    %c0_8 = arith.constant 0 : index
    %7 = vector.load %arg2[%c2210, %c0_8] : memref<2232x128xf32, #tpu.memory_space<vmem>>, vector<1x128xf32>
    %c2211 = arith.constant 2211 : index
    %c0_9 = arith.constant 0 : index
    %8 = vector.load %arg2[%c2211, %c0_9] : memref<2232x128xf32, #tpu.memory_space<vmem>>, vector<1x128xf32>
    %cst = arith.constant dense<0.000000e+00> : vector<64x128xf32>
    %9 = tpu.matmul %4, %2, %cst {dimension_numbers = #tpu.dot_dimension_numbers<[1], [0], [0], [1], [0, 0, 1, 1], [], []>} : vector<64x32xf32>, vector<32x128xf32>, vector<64x128xf32> -> vector<64x128xf32>
    %10 = vector.extract_strided_slice %9 {offsets = [0, 0], sizes = [32, 128], strides = [1, 1]} : vector<64x128xf32> to vector<32x128xf32>
    %11 = vector.extract_strided_slice %9 {offsets = [32, 0], sizes = [32, 128], strides = [1, 1]} : vector<64x128xf32> to vector<32x128xf32>
    %12 = tpu.concatenate %2, %10, %11 in 1 : vector<32x128xf32>, vector<32x128xf32>, vector<32x128xf32> -> vector<32x384xf32>
    %cst_10 = arith.constant dense<0.000000e+00> : vector<32x128xf32>
    %13 = tpu.matmul %12, %3, %cst_10 {dimension_numbers = #tpu.dot_dimension_numbers<[1], [0], [0], [1], [0, 0, 1, 1], [], []>} : vector<32x384xf32>, vector<384x128xf32>, vector<32x128xf32> -> vector<32x128xf32>
    %14 = vector.broadcast %5 : vector<1x128xf32> to vector<32x128xf32>
    %15 = arith.addf %13, %14 : vector<32x128xf32>
    %cst_11 = arith.constant dense<0.000000e+00> : vector<32x128xf32>
    %16 = tpu.matmul %0, %15, %cst_11 {dimension_numbers = #tpu.dot_dimension_numbers<[1], [0], [0], [1], [0, 0, 1, 1], [], []>} : vector<32x32xf32>, vector<32x128xf32>, vector<32x128xf32> -> vector<32x128xf32>
    %cst_12 = arith.constant dense<0.000000e+00> : vector<32x128xf32>
    %17 = tpu.matmul %16, %1, %cst_12 {dimension_numbers = #tpu.dot_dimension_numbers<[1], [0], [0], [1], [0, 0, 1, 1], [], []>} : vector<32x128xf32>, vector<128x128xf32>, vector<32x128xf32> -> vector<32x128xf32>
    %18 = arith.subf %15, %17 : vector<32x128xf32>
    %19 = arith.mulf %18, %18 : vector<32x128xf32>
    %cst_13 = arith.constant dense<0.000000e+00> : vector<32x128xf32>
    %20 = tpu.matmul %0, %19, %cst_13 {dimension_numbers = #tpu.dot_dimension_numbers<[1], [0], [0], [1], [0, 0, 1, 1], [], []>} : vector<32x32xf32>, vector<32x128xf32>, vector<32x128xf32> -> vector<32x128xf32>
    %cst_14 = arith.constant dense<0.000000e+00> : vector<32x128xf32>
    %21 = tpu.matmul %20, %1, %cst_14 {dimension_numbers = #tpu.dot_dimension_numbers<[1], [0], [0], [1], [0, 0, 1, 1], [], []>} : vector<32x128xf32>, vector<128x128xf32>, vector<32x128xf32> -> vector<32x128xf32>
    %cst_15 = arith.constant 9.99999974E-6 : f32
    %22 = vector.broadcast %cst_15 : f32 to vector<32x128xf32>
    %23 = arith.addf %21, %22 : vector<32x128xf32>
    %24 = math.rsqrt %23 : vector<32x128xf32>
    %25 = arith.mulf %18, %24 : vector<32x128xf32>
    %26 = vector.broadcast %6 : vector<1x128xf32> to vector<32x128xf32>
    %27 = arith.mulf %25, %26 : vector<32x128xf32>
    %28 = vector.broadcast %7 : vector<1x128xf32> to vector<32x128xf32>
    %29 = arith.addf %27, %28 : vector<32x128xf32>
    %cst_16 = arith.constant 0.000000e+00 : f32
    %30 = vector.broadcast %cst_16 : f32 to vector<32x128xf32>
    %31 = arith.cmpf oge, %29, %30 : vector<32x128xf32>
    %32 = vector.broadcast %8 : vector<1x128xf32> to vector<32x128xf32>
    %33 = arith.mulf %32, %29 : vector<32x128xf32>
    %34 = arith.select %31, %29, %33 : vector<32x128xi1>, vector<32x128xf32>
    %35 = arith.addf %2, %34 : vector<32x128xf32>
    %c384 = arith.constant 384 : index
    %c0_17 = arith.constant 0 : index
    %36 = vector.load %arg2[%c384, %c0_17] : memref<2232x128xf32, #tpu.memory_space<vmem>>, vector<384x128xf32>
    %c2016 = arith.constant 2016 : index
    %c0_18 = arith.constant 0 : index
    %37 = vector.load %arg2[%c2016, %c0_18] : memref<2232x128xf32, #tpu.memory_space<vmem>>, vector<64x32xf32>
    %c2212 = arith.constant 2212 : index
    %c0_19 = arith.constant 0 : index
    %38 = vector.load %arg2[%c2212, %c0_19] : memref<2232x128xf32, #tpu.memory_space<vmem>>, vector<1x128xf32>
    %c2213 = arith.constant 2213 : index
    %c0_20 = arith.constant 0 : index
    %39 = vector.load %arg2[%c2213, %c0_20] : memref<2232x128xf32, #tpu.memory_space<vmem>>, vector<1x128xf32>
    %c2214 = arith.constant 2214 : index
    %c0_21 = arith.constant 0 : index
    %40 = vector.load %arg2[%c2214, %c0_21] : memref<2232x128xf32, #tpu.memory_space<vmem>>, vector<1x128xf32>
    %c2215 = arith.constant 2215 : index
    %c0_22 = arith.constant 0 : index
    %41 = vector.load %arg2[%c2215, %c0_22] : memref<2232x128xf32, #tpu.memory_space<vmem>>, vector<1x128xf32>
    %cst_23 = arith.constant dense<0.000000e+00> : vector<64x128xf32>
    %42 = tpu.matmul %37, %35, %cst_23 {dimension_numbers = #tpu.dot_dimension_numbers<[1], [0], [0], [1], [0, 0, 1, 1], [], []>} : vector<64x32xf32>, vector<32x128xf32>, vector<64x128xf32> -> vector<64x128xf32>
    %43 = vector.extract_strided_slice %42 {offsets = [0, 0], sizes = [32, 128], strides = [1, 1]} : vector<64x128xf32> to vector<32x128xf32>
    %44 = vector.extract_strided_slice %42 {offsets = [32, 0], sizes = [32, 128], strides = [1, 1]} : vector<64x128xf32> to vector<32x128xf32>
    %45 = tpu.concatenate %35, %43, %44 in 1 : vector<32x128xf32>, vector<32x128xf32>, vector<32x128xf32> -> vector<32x384xf32>
    %cst_24 = arith.constant dense<0.000000e+00> : vector<32x128xf32>
    %46 = tpu.matmul %45, %36, %cst_24 {dimension_numbers = #tpu.dot_dimension_numbers<[1], [0], [0], [1], [0, 0, 1, 1], [], []>} : vector<32x384xf32>, vector<384x128xf32>, vector<32x128xf32> -> vector<32x128xf32>
    %47 = vector.broadcast %38 : vector<1x128xf32> to vector<32x128xf32>
    %48 = arith.addf %46, %47 : vector<32x128xf32>
    %cst_25 = arith.constant dense<0.000000e+00> : vector<32x128xf32>
    %49 = tpu.matmul %0, %48, %cst_25 {dimension_numbers = #tpu.dot_dimension_numbers<[1], [0], [0], [1], [0, 0, 1, 1], [], []>} : vector<32x32xf32>, vector<32x128xf32>, vector<32x128xf32> -> vector<32x128xf32>
    %cst_26 = arith.constant dense<0.000000e+00> : vector<32x128xf32>
    %50 = tpu.matmul %49, %1, %cst_26 {dimension_numbers = #tpu.dot_dimension_numbers<[1], [0], [0], [1], [0, 0, 1, 1], [], []>} : vector<32x128xf32>, vector<128x128xf32>, vector<32x128xf32> -> vector<32x128xf32>
    %51 = arith.subf %48, %50 : vector<32x128xf32>
    %52 = arith.mulf %51, %51 : vector<32x128xf32>
    %cst_27 = arith.constant dense<0.000000e+00> : vector<32x128xf32>
    %53 = tpu.matmul %0, %52, %cst_27 {dimension_numbers = #tpu.dot_dimension_numbers<[1], [0], [0], [1], [0, 0, 1, 1], [], []>} : vector<32x32xf32>, vector<32x128xf32>, vector<32x128xf32> -> vector<32x128xf32>
    %cst_28 = arith.constant dense<0.000000e+00> : vector<32x128xf32>
    %54 = tpu.matmul %53, %1, %cst_28 {dimension_numbers = #tpu.dot_dimension_numbers<[1], [0], [0], [1], [0, 0, 1, 1], [], []>} : vector<32x128xf32>, vector<128x128xf32>, vector<32x128xf32> -> vector<32x128xf32>
    %cst_29 = arith.constant 9.99999974E-6 : f32
    %55 = vector.broadcast %cst_29 : f32 to vector<32x128xf32>
    %56 = arith.addf %54, %55 : vector<32x128xf32>
    %57 = math.rsqrt %56 : vector<32x128xf32>
    %58 = arith.mulf %51, %57 : vector<32x128xf32>
    %59 = vector.broadcast %39 : vector<1x128xf32> to vector<32x128xf32>
    %60 = arith.mulf %58, %59 : vector<32x128xf32>
    %61 = vector.broadcast %40 : vector<1x128xf32> to vector<32x128xf32>
    %62 = arith.addf %60, %61 : vector<32x128xf32>
    %cst_30 = arith.constant 0.000000e+00 : f32
    %63 = vector.broadcast %cst_30 : f32 to vector<32x128xf32>
    %64 = arith.cmpf oge, %62, %63 : vector<32x128xf32>
    %65 = vector.broadcast %41 : vector<1x128xf32> to vector<32x128xf32>
    %66 = arith.mulf %65, %62 : vector<32x128xf32>
    %67 = arith.select %64, %62, %66 : vector<32x128xi1>, vector<32x128xf32>
    %68 = arith.addf %35, %67 : vector<32x128xf32>
    %c768 = arith.constant 768 : index
    %c0_31 = arith.constant 0 : index
    %69 = vector.load %arg2[%c768, %c0_31] : memref<2232x128xf32, #tpu.memory_space<vmem>>, vector<384x128xf32>
    %c2080 = arith.constant 2080 : index
    %c0_32 = arith.constant 0 : index
    %70 = vector.load %arg2[%c2080, %c0_32] : memref<2232x128xf32, #tpu.memory_space<vmem>>, vector<64x32xf32>
    %c2216 = arith.constant 2216 : index
    %c0_33 = arith.constant 0 : index
    %71 = vector.load %arg2[%c2216, %c0_33] : memref<2232x128xf32, #tpu.memory_space<vmem>>, vector<1x128xf32>
    %c2217 = arith.constant 2217 : index
    %c0_34 = arith.constant 0 : index
    %72 = vector.load %arg2[%c2217, %c0_34] : memref<2232x128xf32, #tpu.memory_space<vmem>>, vector<1x128xf32>
    %c2218 = arith.constant 2218 : index
    %c0_35 = arith.constant 0 : index
    %73 = vector.load %arg2[%c2218, %c0_35] : memref<2232x128xf32, #tpu.memory_space<vmem>>, vector<1x128xf32>
    %c2219 = arith.constant 2219 : index
    %c0_36 = arith.constant 0 : index
    %74 = vector.load %arg2[%c2219, %c0_36] : memref<2232x128xf32, #tpu.memory_space<vmem>>, vector<1x128xf32>
    %cst_37 = arith.constant dense<0.000000e+00> : vector<64x128xf32>
    %75 = tpu.matmul %70, %68, %cst_37 {dimension_numbers = #tpu.dot_dimension_numbers<[1], [0], [0], [1], [0, 0, 1, 1], [], []>} : vector<64x32xf32>, vector<32x128xf32>, vector<64x128xf32> -> vector<64x128xf32>
    %76 = vector.extract_strided_slice %75 {offsets = [0, 0], sizes = [32, 128], strides = [1, 1]} : vector<64x128xf32> to vector<32x128xf32>
    %77 = vector.extract_strided_slice %75 {offsets = [32, 0], sizes = [32, 128], strides = [1, 1]} : vector<64x128xf32> to vector<32x128xf32>
    %78 = tpu.concatenate %68, %76, %77 in 1 : vector<32x128xf32>, vector<32x128xf32>, vector<32x128xf32> -> vector<32x384xf32>
    %cst_38 = arith.constant dense<0.000000e+00> : vector<32x128xf32>
    %79 = tpu.matmul %78, %69, %cst_38 {dimension_numbers = #tpu.dot_dimension_numbers<[1], [0], [0], [1], [0, 0, 1, 1], [], []>} : vector<32x384xf32>, vector<384x128xf32>, vector<32x128xf32> -> vector<32x128xf32>
    %80 = vector.broadcast %71 : vector<1x128xf32> to vector<32x128xf32>
    %81 = arith.addf %79, %80 : vector<32x128xf32>
    %cst_39 = arith.constant dense<0.000000e+00> : vector<32x128xf32>
    %82 = tpu.matmul %0, %81, %cst_39 {dimension_numbers = #tpu.dot_dimension_numbers<[1], [0], [0], [1], [0, 0, 1, 1], [], []>} : vector<32x32xf32>, vector<32x128xf32>, vector<32x128xf32> -> vector<32x128xf32>
    %cst_40 = arith.constant dense<0.000000e+00> : vector<32x128xf32>
    %83 = tpu.matmul %82, %1, %cst_40 {dimension_numbers = #tpu.dot_dimension_numbers<[1], [0], [0], [1], [0, 0, 1, 1], [], []>} : vector<32x128xf32>, vector<128x128xf32>, vector<32x128xf32> -> vector<32x128xf32>
    %84 = arith.subf %81, %83 : vector<32x128xf32>
    %85 = arith.mulf %84, %84 : vector<32x128xf32>
    %cst_41 = arith.constant dense<0.000000e+00> : vector<32x128xf32>
    %86 = tpu.matmul %0, %85, %cst_41 {dimension_numbers = #tpu.dot_dimension_numbers<[1], [0], [0], [1], [0, 0, 1, 1], [], []>} : vector<32x32xf32>, vector<32x128xf32>, vector<32x128xf32> -> vector<32x128xf32>
    %cst_42 = arith.constant dense<0.000000e+00> : vector<32x128xf32>
    %87 = tpu.matmul %86, %1, %cst_42 {dimension_numbers = #tpu.dot_dimension_numbers<[1], [0], [0], [1], [0, 0, 1, 1], [], []>} : vector<32x128xf32>, vector<128x128xf32>, vector<32x128xf32> -> vector<32x128xf32>
    %cst_43 = arith.constant 9.99999974E-6 : f32
    %88 = vector.broadcast %cst_43 : f32 to vector<32x128xf32>
    %89 = arith.addf %87, %88 : vector<32x128xf32>
    %90 = math.rsqrt %89 : vector<32x128xf32>
    %91 = arith.mulf %84, %90 : vector<32x128xf32>
    %92 = vector.broadcast %72 : vector<1x128xf32> to vector<32x128xf32>
    %93 = arith.mulf %91, %92 : vector<32x128xf32>
    %94 = vector.broadcast %73 : vector<1x128xf32> to vector<32x128xf32>
    %95 = arith.addf %93, %94 : vector<32x128xf32>
    %cst_44 = arith.constant 0.000000e+00 : f32
    %96 = vector.broadcast %cst_44 : f32 to vector<32x128xf32>
    %97 = arith.cmpf oge, %95, %96 : vector<32x128xf32>
    %98 = vector.broadcast %74 : vector<1x128xf32> to vector<32x128xf32>
    %99 = arith.mulf %98, %95 : vector<32x128xf32>
    %100 = arith.select %97, %95, %99 : vector<32x128xi1>, vector<32x128xf32>
    %101 = arith.addf %68, %100 : vector<32x128xf32>
    %c1152 = arith.constant 1152 : index
    %c0_45 = arith.constant 0 : index
    %102 = vector.load %arg2[%c1152, %c0_45] : memref<2232x128xf32, #tpu.memory_space<vmem>>, vector<384x128xf32>
    %c2144 = arith.constant 2144 : index
    %c0_46 = arith.constant 0 : index
    %103 = vector.load %arg2[%c2144, %c0_46] : memref<2232x128xf32, #tpu.memory_space<vmem>>, vector<64x32xf32>
    %c2220 = arith.constant 2220 : index
    %c0_47 = arith.constant 0 : index
    %104 = vector.load %arg2[%c2220, %c0_47] : memref<2232x128xf32, #tpu.memory_space<vmem>>, vector<1x128xf32>
    %c2221 = arith.constant 2221 : index
    %c0_48 = arith.constant 0 : index
    %105 = vector.load %arg2[%c2221, %c0_48] : memref<2232x128xf32, #tpu.memory_space<vmem>>, vector<1x128xf32>
    %c2222 = arith.constant 2222 : index
    %c0_49 = arith.constant 0 : index
    %106 = vector.load %arg2[%c2222, %c0_49] : memref<2232x128xf32, #tpu.memory_space<vmem>>, vector<1x128xf32>
    %c2223 = arith.constant 2223 : index
    %c0_50 = arith.constant 0 : index
    %107 = vector.load %arg2[%c2223, %c0_50] : memref<2232x128xf32, #tpu.memory_space<vmem>>, vector<1x128xf32>
    %cst_51 = arith.constant dense<0.000000e+00> : vector<64x128xf32>
    %108 = tpu.matmul %103, %101, %cst_51 {dimension_numbers = #tpu.dot_dimension_numbers<[1], [0], [0], [1], [0, 0, 1, 1], [], []>} : vector<64x32xf32>, vector<32x128xf32>, vector<64x128xf32> -> vector<64x128xf32>
    %109 = vector.extract_strided_slice %108 {offsets = [0, 0], sizes = [32, 128], strides = [1, 1]} : vector<64x128xf32> to vector<32x128xf32>
    %110 = vector.extract_strided_slice %108 {offsets = [32, 0], sizes = [32, 128], strides = [1, 1]} : vector<64x128xf32> to vector<32x128xf32>
    %111 = tpu.concatenate %101, %109, %110 in 1 : vector<32x128xf32>, vector<32x128xf32>, vector<32x128xf32> -> vector<32x384xf32>
    %cst_52 = arith.constant dense<0.000000e+00> : vector<32x128xf32>
    %112 = tpu.matmul %111, %102, %cst_52 {dimension_numbers = #tpu.dot_dimension_numbers<[1], [0], [0], [1], [0, 0, 1, 1], [], []>} : vector<32x384xf32>, vector<384x128xf32>, vector<32x128xf32> -> vector<32x128xf32>
    %113 = vector.broadcast %104 : vector<1x128xf32> to vector<32x128xf32>
    %114 = arith.addf %112, %113 : vector<32x128xf32>
    %cst_53 = arith.constant dense<0.000000e+00> : vector<32x128xf32>
    %115 = tpu.matmul %0, %114, %cst_53 {dimension_numbers = #tpu.dot_dimension_numbers<[1], [0], [0], [1], [0, 0, 1, 1], [], []>} : vector<32x32xf32>, vector<32x128xf32>, vector<32x128xf32> -> vector<32x128xf32>
    %cst_54 = arith.constant dense<0.000000e+00> : vector<32x128xf32>
    %116 = tpu.matmul %115, %1, %cst_54 {dimension_numbers = #tpu.dot_dimension_numbers<[1], [0], [0], [1], [0, 0, 1, 1], [], []>} : vector<32x128xf32>, vector<128x128xf32>, vector<32x128xf32> -> vector<32x128xf32>
    %117 = arith.subf %114, %116 : vector<32x128xf32>
    %118 = arith.mulf %117, %117 : vector<32x128xf32>
    %cst_55 = arith.constant dense<0.000000e+00> : vector<32x128xf32>
    %119 = tpu.matmul %0, %118, %cst_55 {dimension_numbers = #tpu.dot_dimension_numbers<[1], [0], [0], [1], [0, 0, 1, 1], [], []>} : vector<32x32xf32>, vector<32x128xf32>, vector<32x128xf32> -> vector<32x128xf32>
    %cst_56 = arith.constant dense<0.000000e+00> : vector<32x128xf32>
    %120 = tpu.matmul %119, %1, %cst_56 {dimension_numbers = #tpu.dot_dimension_numbers<[1], [0], [0], [1], [0, 0, 1, 1], [], []>} : vector<32x128xf32>, vector<128x128xf32>, vector<32x128xf32> -> vector<32x128xf32>
    %cst_57 = arith.constant 9.99999974E-6 : f32
    %121 = vector.broadcast %cst_57 : f32 to vector<32x128xf32>
    %122 = arith.addf %120, %121 : vector<32x128xf32>
    %123 = math.rsqrt %122 : vector<32x128xf32>
    %124 = arith.mulf %117, %123 : vector<32x128xf32>
    %125 = vector.broadcast %105 : vector<1x128xf32> to vector<32x128xf32>
    %126 = arith.mulf %124, %125 : vector<32x128xf32>
    %127 = vector.broadcast %106 : vector<1x128xf32> to vector<32x128xf32>
    %128 = arith.addf %126, %127 : vector<32x128xf32>
    %cst_58 = arith.constant 0.000000e+00 : f32
    %129 = vector.broadcast %cst_58 : f32 to vector<32x128xf32>
    %130 = arith.cmpf oge, %128, %129 : vector<32x128xf32>
    %131 = vector.broadcast %107 : vector<1x128xf32> to vector<32x128xf32>
    %132 = arith.mulf %131, %128 : vector<32x128xf32>
    %133 = arith.select %130, %128, %132 : vector<32x128xi1>, vector<32x128xf32>
    %c1536 = arith.constant 1536 : index
    %c0_59 = arith.constant 0 : index
    %134 = vector.load %arg2[%c1536, %c0_59] : memref<2232x128xf32, #tpu.memory_space<vmem>>, vector<128x128xf32>
    %c1792 = arith.constant 1792 : index
    %c0_60 = arith.constant 0 : index
    %135 = vector.load %arg2[%c1792, %c0_60] : memref<2232x128xf32, #tpu.memory_space<vmem>>, vector<128x128xf32>
    %c2224 = arith.constant 2224 : index
    %c0_61 = arith.constant 0 : index
    %136 = vector.load %arg2[%c2224, %c0_61] : memref<2232x128xf32, #tpu.memory_space<vmem>>, vector<1x128xf32>
    %c2225 = arith.constant 2225 : index
    %c0_62 = arith.constant 0 : index
    %137 = vector.load %arg2[%c2225, %c0_62] : memref<2232x128xf32, #tpu.memory_space<vmem>>, vector<1x128xf32>
    %c2226 = arith.constant 2226 : index
    %c0_63 = arith.constant 0 : index
    %138 = vector.load %arg2[%c2226, %c0_63] : memref<2232x128xf32, #tpu.memory_space<vmem>>, vector<1x128xf32>
    %c2227 = arith.constant 2227 : index
    %c0_64 = arith.constant 0 : index
    %139 = vector.load %arg2[%c2227, %c0_64] : memref<2232x128xf32, #tpu.memory_space<vmem>>, vector<1x128xf32>
    %c2228 = arith.constant 2228 : index
    %c0_65 = arith.constant 0 : index
    %140 = vector.load %arg2[%c2228, %c0_65] : memref<2232x128xf32, #tpu.memory_space<vmem>>, vector<1x128xf32>
    %c2229 = arith.constant 2229 : index
    %c0_66 = arith.constant 0 : index
    %141 = vector.load %arg2[%c2229, %c0_66] : memref<2232x128xf32, #tpu.memory_space<vmem>>, vector<1x128xf32>
    %cst_67 = arith.constant dense<0.000000e+00> : vector<32x128xf32>
    %142 = tpu.matmul %133, %134, %cst_67 {dimension_numbers = #tpu.dot_dimension_numbers<[1], [0], [0], [1], [0, 0, 1, 1], [], []>} : vector<32x128xf32>, vector<128x128xf32>, vector<32x128xf32> -> vector<32x128xf32>
    %143 = vector.broadcast %136 : vector<1x128xf32> to vector<32x128xf32>
    %144 = arith.addf %142, %143 : vector<32x128xf32>
    %cst_68 = arith.constant dense<0.000000e+00> : vector<32x128xf32>
    %145 = tpu.matmul %0, %144, %cst_68 {dimension_numbers = #tpu.dot_dimension_numbers<[1], [0], [0], [1], [0, 0, 1, 1], [], []>} : vector<32x32xf32>, vector<32x128xf32>, vector<32x128xf32> -> vector<32x128xf32>
    %cst_69 = arith.constant dense<0.000000e+00> : vector<32x128xf32>
    %146 = tpu.matmul %145, %135, %cst_69 {dimension_numbers = #tpu.dot_dimension_numbers<[1], [0], [0], [1], [0, 0, 1, 1], [], []>} : vector<32x128xf32>, vector<128x128xf32>, vector<32x128xf32> -> vector<32x128xf32>
    %147 = arith.subf %144, %146 : vector<32x128xf32>
    %148 = arith.mulf %147, %147 : vector<32x128xf32>
    %cst_70 = arith.constant dense<0.000000e+00> : vector<32x128xf32>
    %149 = tpu.matmul %0, %148, %cst_70 {dimension_numbers = #tpu.dot_dimension_numbers<[1], [0], [0], [1], [0, 0, 1, 1], [], []>} : vector<32x32xf32>, vector<32x128xf32>, vector<32x128xf32> -> vector<32x128xf32>
    %cst_71 = arith.constant dense<0.000000e+00> : vector<32x128xf32>
    %150 = tpu.matmul %149, %135, %cst_71 {dimension_numbers = #tpu.dot_dimension_numbers<[1], [0], [0], [1], [0, 0, 1, 1], [], []>} : vector<32x128xf32>, vector<128x128xf32>, vector<32x128xf32> -> vector<32x128xf32>
    %cst_72 = arith.constant 9.99999974E-6 : f32
    %151 = vector.broadcast %cst_72 : f32 to vector<32x128xf32>
    %152 = arith.addf %150, %151 : vector<32x128xf32>
    %153 = math.rsqrt %152 : vector<32x128xf32>
    %154 = arith.mulf %147, %153 : vector<32x128xf32>
    %155 = vector.broadcast %137 : vector<1x128xf32> to vector<32x128xf32>
    %156 = arith.mulf %154, %155 : vector<32x128xf32>
    %157 = vector.broadcast %138 : vector<1x128xf32> to vector<32x128xf32>
    %158 = arith.addf %156, %157 : vector<32x128xf32>
    %cst_73 = arith.constant 0.000000e+00 : f32
    %159 = vector.broadcast %cst_73 : f32 to vector<32x128xf32>
    %160 = arith.cmpf oge, %158, %159 : vector<32x128xf32>
    %161 = vector.broadcast %139 : vector<1x128xf32> to vector<32x128xf32>
    %162 = arith.mulf %161, %158 : vector<32x128xf32>
    %163 = arith.select %160, %158, %162 : vector<32x128xi1>, vector<32x128xf32>
    %164 = vector.broadcast %140 : vector<1x128xf32> to vector<32x128xf32>
    %165 = arith.mulf %163, %164 : vector<32x128xf32>
    %166 = vector.broadcast %141 : vector<1x128xf32> to vector<32x128xf32>
    %167 = arith.addf %165, %166 : vector<32x128xf32>
    %cst_74 = arith.constant 0.000000e+00 : f32
    %168 = vector.broadcast %cst_74 : f32 to vector<32x128xf32>
    %169 = arith.subf %168, %167 : vector<32x128xf32>
    %170 = math.exp %169 : vector<32x128xf32>
    %cst_75 = arith.constant 1.000000e+00 : f32
    %171 = vector.broadcast %cst_75 : f32 to vector<32x128xf32>
    %172 = arith.addf %171, %170 : vector<32x128xf32>
    %173 = tpu.reciprocal %172 {approx = true} : vector<32x128xf32> -> vector<32x128xf32>
    %cst_76 = arith.constant 2.000000e+00 : f32
    %174 = vector.broadcast %cst_76 : f32 to vector<32x128xf32>
    %175 = arith.mulf %174, %173 : vector<32x128xf32>
    %c0_77 = arith.constant 0 : index
    %c0_78 = arith.constant 0 : index
    %176 = vector.load %arg3[%c0_77, %c0_78] : memref<32x128xf32, #tpu.memory_space<vmem>>, vector<32x128xf32>
    tpu.vector_store %arg3[%c0_77, %c0_78], %175 {strides = array<i32>} : memref<32x128xf32, #tpu.memory_space<vmem>>, vector<32x128xf32>,
    return
  }
  func.func @transform_0(%arg0: i32) -> (i32, i32) {
    %c0_i32 = arith.constant 0 : i32
    %c0_i32_0 = arith.constant 0 : i32
    %c0_i32_1 = arith.constant 0 : i32
    return %c0_i32, %c0_i32_0 : i32, i32
  }
  func.func @transform_1(%arg0: i32) -> (i32, i32) {
    %c0_i32 = arith.constant 0 : i32
    %c0_i32_0 = arith.constant 0 : i32
    %c0_i32_1 = arith.constant 0 : i32
    return %c0_i32, %c0_i32_0 : i32, i32
  }
  func.func @transform_2(%arg0: i32) -> (i32, i32) {
    %c0_i32 = arith.constant 0 : i32
    %c0_i32_0 = arith.constant 0 : i32
    %c0_i32_1 = arith.constant 0 : i32
    return %c0_i32, %c0_i32_0 : i32, i32
  }
}

</mosaic_0001>

<bundles_post_ra>
// kernel: mask_decoder_forward.1
= control target key start
LH: loop header
LB: loop body
LE: loop exit
PB: predicated region body
PF: predicated region fallthrough
CT: control target
= control target key end

     0   :  { %7 = vsyncpa [#allocation3], 0  ;;  %s5940_s9 = smov [#allocation2]   ;;  %s6463_s0 = inlined_call_operand.vmem [shape: f32[32,128], index: 0, kind: input, shape index: {}]   ;;  %s6464_s1 = inlined_call_operand.hbm [shape: f32[2232,128], index: 1, kind: input, shape index: {}]   ;;  %s6465_s2 = inlined_call_operand.vmem [shape: f32[32,128], index: 2, kind: output, shape index: {}]  }
   0x1   :  { %s15_s10 = sshll.u32 %s5940_s9, 4  ;;  %s5916_s13 = scalar_lea.hbm %s6464_s1, 35712  ;;  %s16_s10 = int_to_ptr.vmem [resolvable:$true] %s15_s10 }
   0x2   :  { %p5917_p0 = scmp.ne.s32.totalorder %s6464_s1, %s5916_s13  ;;  %p5920_p1 = scmp.lt.u32.totalorder %s5916_s13, %s6464_s1 }
   0x4   :  { %p5922_p2 = pnand %p5920_p1, %p5917_p0 }
   0x6   :  { %5925 = shalt.err (!%p5922_p2)
}
   0x7   :  { %s5926_s18 = scalar_lea.vmem %s16_s10, 35712  ;;  %p5931_p4 = scmp.lt.s32.totalorder %s16_s10, %s16_s10 }
   0x8   :  { %p5927_p3 = scmp.ne.s32.totalorder %s16_s10, %s5926_s18  ;;  %p5932_p5 = scmp.lt.s32.totalorder %s5926_s18, %s5926_s18 }
   0xa   :  { %p5933_p6 = por %p5932_p5, %p5931_p4 }
   0xc   :  { %p5934_p7 = pnand %p5933_p6, %p5927_p3 }
   0xe   :  { %5937 = shalt.err (!%p5934_p7)
}
   0xf   :  { %s5941_s19 = smov 128   ;;  %s5942_s20 = smov 8  }
  0x10   :  { %21 = dma.hbm_to_vmem [thread:$0]  %s6464_s1, 35712, %s16_s10, [#allocation3], %s5941_s19, %s5941_s19, %s5942_s20  }
  0x11   :  { %5938 = dma.done.wait [#allocation3], 35712  }
  0x12   :  { %5939 = vsyncadd [#allocation3], 4294931584  ;;  %vm109_vm0 = vcmask 261120   ;;  %v5973_v0 = vld [vmem:[%s6463_s0] sm:$0xff]  ;;  %v5978_v1 = vld [vmem:[%s6463_s0 + $0x8] sm:$0xff] }
  0x13   :  { %v5983_v2 = vld [vmem:[%s6463_s0 + $0x10] sm:$0xff]  ;;  %v5130_v3 = vpack.c.bf16 %v5978_v1, %v5973_v0  ;;  %v5990_v4 = vld [vmem:[%s6463_s0 + $0x18] sm:$0xff]  ;;  %v97_v5 = vld [vmem:[#allocation2 + $0x7a0] sm:$0xff] }
  0x14   :  { %v5134_v6 = vpack.c.bf16 %v5990_v4, %v5983_v2  ;;  %4348 = vmatprep.mubr.msk.f32.mxu0 %vm109_vm0, %v97_v5  ;;  %v65_v7 = vld [vmem:[#allocation2 + $0x80] sm:$0xff]  ;;  %v66_v8 = vld [vmem:[#allocation2 + $0x88] sm:$0xff]  ;;  %v67_v12 = vld [vmem:[#allocation2 + $0x90] sm:$0xff] }
  0x15   :  { %5131 = vmatprep.subr.bf16.mxu0 %v5130_v3  ;;  %v49_v9 = vld [vmem:[#allocation2] sm:$0xff]  ;;  %v5138_v10 = vpack.c.bf16 %v66_v8, %v65_v7  ;;  %v50_v11 = vld [vmem:[#allocation2 + $0x8] sm:$0xff]  ;;  %v68_v13 = vld [vmem:[#allocation2 + $0x98] sm:$0xff] }
  0x16   :  { %5133 = vmatpush3.bf16.msra.mxu0 %v5130_v3  ;;  %v5140_v14 = vpack.c.bf16 %v50_v11, %v49_v9  ;;  %v5142_v15 = vpack.c.bf16 %v68_v13, %v67_v12  ;;  %v51_v16 = vld [vmem:[#allocation2 + $0x10] sm:$0xff]  ;;  %v52_v17 = vld [vmem:[#allocation2 + $0x18] sm:$0xff]  ;;  %v69_v18 = vld [vmem:[#allocation2 + $0xa0] sm:$0xff] }
  0x17   :  { %5135 = vmatprep.subr.bf16.mxu0 %v5134_v6  ;;  %5139 = vmatprep.subr.bf16.mxu1 %v5138_v10  ;;  %v70_v19 = vld [vmem:[#allocation2 + $0xa8] sm:$0xff]  ;;  %v81_v20 = vld [vmem:[#allocation2 + $0x100] sm:$0xff]  ;;  %v99_v23 = vld [vmem:[#allocation2 + $0x7b0] sm:$0xff]  ;;  %v5144_v24 = vpack.c.bf16 %v52_v17, %v51_v16 }
  0x18   :  { %v82_v21 = vld [vmem:[#allocation2 + $0x108] sm:$0xff]  ;;  %5141 = vmatpush3.bf16.msra.mxu1 %v5140_v14  ;;  %v53_v26 = vld [vmem:[#allocation2 + $0x20] sm:$0xff]  ;;  %v5146_v27 = vpack.c.bf16 %v70_v19, %v69_v18  ;;  %v83_v29 = vld [vmem:[#allocation2 + $0x110] sm:$0xff] }
  0x19   :  { %v98_v22 = vld [vmem:[#allocation2 + $0x7a8] sm:$0xff]  ;;  %v5170_v25 = vpack.c.bf16 %v82_v21, %v81_v20  ;;  %5143 = vmatprep.subr.bf16.mxu1 %v5142_v15  ;;  %v84_v30 = vld [vmem:[#allocation2 + $0x118] sm:$0xff]  ;;  %v71_v31 = vld [vmem:[#allocation2 + $0xb0] sm:$0xff] }
  0x1a   :  { %5137 = vmatpush3.bf16.msra.mxu0 %v5134_v6  ;;  %v54_v28 = vld [vmem:[#allocation2 + $0x28] sm:$0xff]  ;;  %v72_v32 = vld [vmem:[#allocation2 + $0xb8] sm:$0xff]  ;;  %v5174_v33 = vpack.c.bf16 %v84_v30, %v83_v29  ;;  %v85_v34 = vld [vmem:[#allocation2 + $0x120] sm:$0xff] }
  0x1b   :  { %5171 = vmatprep.subr.bf16.mxu0 %v5170_v25  ;;  %v86_v35 = vld [vmem:[#allocation2 + $0x128] sm:$0xff]  ;;  %v100_v36 = vld [vmem:[#allocation2 + $0x7b8] sm:$0xff]  ;;  %v5148_v37 = vpack.c.bf16 %v54_v28, %v53_v26  ;;  %v101_v38 = vld [vmem:[#allocation2 + $0x7c0] sm:$0xff]  ;;  %v5150_v39 = vpack.c.bf16 %v72_v32, %v71_v31 }
  0x1c   :  { %5145 = vmatpush3.bf16.msra.mxu1 %v5144_v24  ;;  %v55_v40 = vld [vmem:[#allocation2 + $0x30] sm:$0xff]  ;;  %v56_v41 = vld [vmem:[#allocation2 + $0x38] sm:$0xff]  ;;  %v73_v42 = vld [vmem:[#allocation2 + $0xc0] sm:$0xff]  ;;  %v5178_v44 = vpack.c.bf16 %v86_v35, %v85_v34 }
  0x1d   :  { %4349 = vmatmul.mubr.msk.f32.vlgmr.msra.gmra.mrb[0].mxu0 %vm109_vm0, %v98_v22  ;;  %5147 = vmatprep.subr.bf16.mxu1 %v5146_v27  ;;  %v74_v43 = vld [vmem:[#allocation2 + $0xc8] sm:$0xff]  ;;  %v87_v45 = vld [vmem:[#allocation2 + $0x130] sm:$0xff]  ;;  %v88_v46 = vld [vmem:[#allocation2 + $0x138] sm:$0xff]  ;;  %v5152_v48 = vpack.c.bf16 %v56_v41, %v55_v40 }
  0x1e   :  { %4351 = vmatprep.mubr.msk.f32.mxu0 %vm109_vm0, %v99_v23  ;;  %5173 = vmatpush3.bf16.msra.mxu0 %v5170_v25  ;;  %v102_v47 = vld [vmem:[#allocation2 + $0x7c8] sm:$0xff]  ;;  %v103_v49 = vld [vmem:[#allocation2 + $0x7d0] sm:$0xff]  ;;  %v5154_v50 = vpack.c.bf16 %v74_v43, %v73_v42  ;;  %v57_v51 = vld [vmem:[#allocation2 + $0x40] sm:$0xff]  ;;  %v5182_v55 = vpack.c.bf16 %v88_v46, %v87_v45 }
  0x1f   :  { %5175 = vmatprep.subr.bf16.mxu0 %v5174_v33  ;;  %v58_v52 = vld [vmem:[#allocation2 + $0x48] sm:$0xff]  ;;  %v75_v53 = vld [vmem:[#allocation2 + $0xd0] sm:$0xff]  ;;  %v76_v54 = vld [vmem:[#allocation2 + $0xd8] sm:$0xff] }
  0x20   :  { %5149 = vmatpush3.bf16.msra.mxu1 %v5148_v37  ;;  %v89_v56 = vld [vmem:[#allocation2 + $0x140] sm:$0xff]  ;;  %v90_v57 = vld [vmem:[#allocation2 + $0x148] sm:$0xff]  ;;  %v104_v58 = vld [vmem:[#allocation2 + $0x7d8] sm:$0xff]  ;;  %v5156_v59 = vpack.c.bf16 %v58_v52, %v57_v51  ;;  %v5158_v60 = vpack.c.bf16 %v76_v54, %v75_v53 }
  0x21   :  { %4352 = vmatmul.mubr.msk.f32.gmra.mrb[2].mxu0 %vm109_vm0, %v100_v36  ;;  %5151 = vmatprep.subr.bf16.mxu1 %v5150_v39  ;;  %v59_v61 = vld [vmem:[#allocation2 + $0x50] sm:$0xff]  ;;  %v60_v62 = vld [vmem:[#allocation2 + $0x58] sm:$0xff]  ;;  %v77_v63 = vld [vmem:[#allocation2 + $0xe0] sm:$0xff]  ;;  %v5186_v5 = vpack.c.bf16 %v90_v57, %v89_v56 }
  0x22   :  { %4354 = vmatprep.mubr.msk.f32.mxu0 %vm109_vm0, %v101_v38  ;;  %5177 = vmatpush3.bf16.msra.mxu0 %v5174_v33  ;;  %v78_v3 = vld [vmem:[#allocation2 + $0xe8] sm:$0xff]  ;;  %v91_v6 = vld [vmem:[#allocation2 + $0x150] sm:$0xff]  ;;  %v92_v7 = vld [vmem:[#allocation2 + $0x158] sm:$0xff]  ;;  %v5160_v8 = vpack.c.bf16 %v60_v62, %v59_v61 }
  0x23   :  { %5179 = vmatprep.subr.bf16.mxu0 %v5178_v44  ;;  %v5162_v9 = vpack.c.bf16 %v78_v3, %v77_v63  ;;  %v61_v10 = vld [vmem:[#allocation2 + $0x60] sm:$0xff]  ;;  %v62_v11 = vld [vmem:[#allocation2 + $0x68] sm:$0xff]  ;;  %v79_v12 = vld [vmem:[#allocation2 + $0xf0] sm:$0xff]  ;;  %v5190_v14 = vpack.c.bf16 %v92_v7, %v91_v6 }
  0x24   :  { %5153 = vmatpush3.bf16.msra.mxu1 %v5152_v48  ;;  %v80_v13 = vld [vmem:[#allocation2 + $0xf8] sm:$0xff]  ;;  %v5164_v15 = vpack.c.bf16 %v62_v11, %v61_v10  ;;  %v63_v17 = vld [vmem:[#allocation2 + $0x70] sm:$0xff]  ;;  %v93_v20 = vld [vmem:[#allocation2 + $0x160] sm:$0xff] }
  0x25   :  { %4355 = vmatmul.mubr.msk.f32.gmra.mrb[4].mxu0 %vm109_vm0, %v102_v47  ;;  %5155 = vmatprep.subr.bf16.mxu1 %v5154_v50  ;;  %v5166_v16 = vpack.c.bf16 %v80_v13, %v79_v12  ;;  %v64_v18 = vld [vmem:[#allocation2 + $0x78] sm:$0xff]  ;;  %v94_v21 = vld [vmem:[#allocation2 + $0x168] sm:$0xff]  ;;  %v95_v23 = vld [vmem:[#allocation2 + $0x170] sm:$0xff] }
  0x26   :  { %4357 = vmatprep.mubr.msk.f32.mxu0 %vm109_vm0, %v103_v49  ;;  %5181 = vmatpush3.bf16.msra.mxu0 %v5178_v44  ;;  %v5168_v19 = vpack.c.bf16 %v64_v18, %v63_v17  ;;  %v5194_v22 = vpack.c.bf16 %v94_v21, %v93_v20  ;;  %v96_v24 = vld [vmem:[#allocation2 + $0x178] sm:$0xff]  ;;  %v6006_v34 = vld [vmem:[#allocation2 + $0x780] sm:$0xff]  ;;  %v30_v36 = vld [vmem:[#allocation2 + $0x688] sm:$0xff] }
  0x27   :  { %5183 = vmatprep.subr.bf16.mxu0 %v5182_v55  ;;  %v5198_v25 = vpack.c.bf16 %v96_v24, %v95_v23  ;;  %v29_v35 = vld [vmem:[#allocation2 + $0x680] sm:$0xff]  ;;  %v31_v37 = vld [vmem:[#allocation2 + $0x690] sm:$0xff]  ;;  %v32_v39 = vld [vmem:[#allocation2 + $0x698] sm:$0xff] }
  0x28   :  { %5157 = vmatpush3.bf16.msra.mxu1 %v5156_v59  ;;  %v6010_v38 = vpack.c.bf16 %v30_v36, %v29_v35  ;;  %v6012_v40 = vpack.c.bf16 %v32_v39, %v31_v37  ;;  %v33_v41 = vld [vmem:[#allocation2 + $0x6a0] sm:$0xff]  ;;  %v34_v42 = vld [vmem:[#allocation2 + $0x6a8] sm:$0xff]  ;;  %v35_v44 = vld [vmem:[#allocation2 + $0x6b0] sm:$0xff] }
  0x29   :  { %4358 = vmatmul.mubr.msk.f32.gmra.mrb[6].mxu0 %vm109_vm0, %v104_v58  ;;  %5159 = vmatprep.subr.bf16.mxu1 %v5158_v60  ;;  %v6017_v43 = vpack.c.bf16 %v34_v42, %v33_v41  ;;  %v36_v45 = vld [vmem:[#allocation2 + $0x6b8] sm:$0xff]  ;;  %v37_v47 = vld [vmem:[#allocation2 + $0x6c0] sm:$0xff]  ;;  %v38_v48 = vld [vmem:[#allocation2 + $0x6c8] sm:$0xff] }
  0x2a   :  { %5185 = vmatpush3.bf16.msra.mxu0 %v5182_v55  ;;  %v6021_v46 = vpack.c.bf16 %v36_v45, %v35_v44  ;;  %v6025_v49 = vpack.c.bf16 %v38_v48, %v37_v47  ;;  %v39_v50 = vld [vmem:[#allocation2 + $0x6d0] sm:$0xff]  ;;  %v40_v51 = vld [vmem:[#allocation2 + $0x6d8] sm:$0xff]  ;;  %v41_v53 = vld [vmem:[#allocation2 + $0x6e0] sm:$0xff] }
  0x2b   :  { %5187 = vmatprep.subr.bf16.mxu0 %v5186_v5  ;;  %v6029_v52 = vpack.c.bf16 %v40_v51, %v39_v50  ;;  %v42_v54 = vld [vmem:[#allocation2 + $0x6e8] sm:$0xff]  ;;  %v43_v56 = vld [vmem:[#allocation2 + $0x6f0] sm:$0xff]  ;;  %v44_v57 = vld [vmem:[#allocation2 + $0x6f8] sm:$0xff] }
  0x2c   :  { %5161 = vmatpush3.bf16.msra.mxu1 %v5160_v8  ;;  %v6033_v55 = vpack.c.bf16 %v42_v54, %v41_v53  ;;  %v6037_v58 = vpack.c.bf16 %v44_v57, %v43_v56  ;;  %v3650_v3 = vld [vmem:[#allocation2 + $0x8a0] ss:$0 sm:$0xff] }
  0x2d   :  { %5163 = vmatprep.subr.bf16.mxu1 %v5162_v9 }
  0x2e   :  { %5189 = vmatpush3.bf16.msra.mxu0 %v5186_v5 }
  0x2f   :  { %5191 = vmatprep.subr.bf16.mxu0 %v5190_v14 }
  0x30   :  { %5165 = vmatpush3.bf16.msra.mxu1 %v5164_v15 }
  0x31   :  { %5167 = vmatprep.subr.bf16.mxu1 %v5166_v16 }
  0x32   :  { %5193 = vmatpush3.bf16.msra.mxu0 %v5190_v14 }
  0x33   :  { %5195 = vmatprep.subr.bf16.mxu0 %v5194_v22 }
  0x34   :  { %5169 = vmatpush3.bf16.msra.mxu1 %v5168_v19 }
  0x35   :  { %5211 = vmatprep.subr.bf16.mxu1 %v6010_v38 }
  0x36   :  { %5197 = vmatpush3.bf16.msra.mxu0 %v5194_v22 }
  0x37   :  { %5199 = vmatprep.subr.bf16.mxu0 %v5198_v25 }
  0x3a   :  { %5201 = vmatpush3.bf16.msra.mxu0 %v5198_v25 }
  0xf0   :  { %v4350_v26 = vpop.f32.mrb[0].mxu0 }
  0xf1   :  { %v200_v27 = vpop.f32.mrb[1].mxu0 }
  0xf2   :  { %307 = vmatprep.mubr.f32.mxu1 %v200_v27  ;;  %v6044_v27 = vld [vmem:[#allocation2 + $0x790] sm:$0xff] }
  0xf3   :  { %308 = vmatmul.mubr.f32.vlgmr.msra.gmra.mrb[0].mxu1 %v5973_v0 }
  0xf4   :  { %312 = vmatprep.mubr.f32.mxu1 %v4350_v26  ;;  %v4353_v28 = vpop.f32.mrb[2].mxu0  ;;  %5213 = vmatpush3.bf16.msra.mxu1 %v6010_v38  ;;  %v6042_v26 = vld [vmem:[#allocation2 + $0x788] sm:$0xff] }
  0xf5   :  { %v210_v29 = vpop.f32.mrb[3].mxu0  ;;  %5215 = vmatprep.subr.bf16.mxu1 %v6012_v40 }
  0xf7   :  { %313 = vmatmul.mubr.f32.gmra.mrb[2].mxu1 %v5978_v1 }
  0xf8   :  { %v4356_v30 = vpop.f32.mrb[4].mxu0  ;;  %317 = vmatprep.mubr.f32.mxu1 %v210_v29  ;;  %5217 = vmatpush3.bf16.msra.mxu1 %v6012_v40 }
  0xf9   :  { %v220_v31 = vpop.f32.mrb[5].mxu0  ;;  %5219 = vmatprep.subr.bf16.mxu1 %v6017_v43 }
  0xfa   :  { %4392 = vmatprep.mubr.f32.mxu0 %v220_v31 }
  0xfb   :  { %318 = vmatmul.mubr.f32.gmra.mrb[4].mxu1 %v5983_v2  ;;  %4393 = vmatmul.mubr.f32.vlgmr.msra.gmra.mrb[8].mxu0 %v4356_v30 }
  0xfc   :  { %v4359_v32 = vpop.f32.mrb[6].mxu0  ;;  %322 = vmatprep.mubr.f32.mxu1 %v4353_v28  ;;  %5221 = vmatpush3.bf16.msra.mxu1 %v6017_v43  ;;  %v6050_v28 = vld [vmem:[#allocation2 + $0x798] sm:$0xff] }
  0xfd   :  { %v230_v33 = vpop.f32.mrb[7].mxu0  ;;  %5223 = vmatprep.subr.bf16.mxu1 %v6021_v46 }
  0xfe   :  { %4395 = vmatprep.mubr.f32.mxu0 %v230_v33 }
  0xff   :  { %323 = vmatmul.mubr.f32.gmra.mrb[6].mxu1 %v5990_v4  ;;  %4396 = vmatmul.mubr.f32.gmra.mrb[10].mxu0 %v4359_v32 }
 0x100   :  { %4406 = vmatprep.mubr.msk.f32.mxu0 %vm109_vm0, %v6006_v34  ;;  %5225 = vmatpush3.bf16.msra.mxu1 %v6021_v46 }
 0x101   :  { %5227 = vmatprep.subr.bf16.mxu1 %v6025_v49 }
 0x104   :  { %5229 = vmatpush3.bf16.msra.mxu1 %v6025_v49 }
 0x105   :  { %5231 = vmatprep.subr.bf16.mxu1 %v6029_v52 }
 0x108   :  { %5233 = vmatpush3.bf16.msra.mxu1 %v6029_v52 }
 0x109   :  { %5235 = vmatprep.subr.bf16.mxu1 %v6033_v55 }
 0x10c   :  { %5237 = vmatpush3.bf16.msra.mxu1 %v6033_v55 }
 0x10d   :  { %5239 = vmatprep.subr.bf16.mxu1 %v6037_v58 }
 0x110   :  { %5241 = vmatpush3.bf16.msra.mxu1 %v6037_v58 }
 0x1c6   :  { %v3780_v59 = vpop.f32.mrb[0].mxu1 }
 0x1c7   :  { %v3781_v60 = vpop.f32.mrb[1].mxu1 }
 0x1c8   :  { %v3782_v61 = vadd.f32 %v3781_v60, %v3780_v59  ;;  %v865_v60 = vld [vmem:[#allocation2 + $0x7e0] sm:$0xff] }
 0x1ca   :  { %v3783_v62 = vpop.f32.mrb[2].mxu1  ;;  %v310_v9 = vadd.f32 %v3782_v61, %v3650_v3  ;;  %v833_v61 = vld [vmem:[#allocation2 + $0x200] sm:$0xff] }
 0x1cb   :  { %v3784_v63 = vpop.f32.mrb[3].mxu1 }
 0x1cc   :  { %v3785_v5 = vadd.f32 %v3784_v63, %v3783_v62  ;;  %v834_v62 = vld [vmem:[#allocation2 + $0x208] sm:$0xff]  ;;  %v817_v63 = vld [vmem:[#allocation2 + $0x180] sm:$0xff] }
 0x1ce   :  { %v3786_v6 = vpop.f32.mrb[4].mxu1  ;;  %v315_v7 = vadd.f32 %v3785_v5, %v3650_v3  ;;  %v4394_v8 = vpop.f32.mrb[8].mxu0  ;;  %v818_v5 = vld [vmem:[#allocation2 + $0x188] sm:$0xff] }
 0x1cf   :  { %v3787_v10 = vpop.f32.mrb[5].mxu1  ;;  %v394_v11 = vpop.f32.mrb[9].mxu0 }
 0x1d0   :  { %v400_v12 = vadd.f32 %v4394_v8, %v315_v7  ;;  %v3788_v13 = vadd.f32 %v3787_v10, %v3786_v6  ;;  %v395_v14 = vadd.f32 %v394_v11, %v310_v9  ;;  %v835_v6 = vld [vmem:[#allocation2 + $0x210] sm:$0xff]  ;;  %v836_v7 = vld [vmem:[#allocation2 + $0x218] sm:$0xff]  ;;  %v5292_v8 = vpack.c.bf16 %v818_v5, %v817_v63 }
 0x1d1   :  { %v5294_v9 = vpack.c.bf16 %v836_v7, %v835_v6  ;;  %v819_v10 = vld [vmem:[#allocation2 + $0x190] sm:$0xff]  ;;  %v820_v11 = vld [vmem:[#allocation2 + $0x198] sm:$0xff] }
 0x1d2   :  { %v5202_v15 = vpack.c.bf16 %v400_v12, %v395_v14  ;;  %v3789_v16 = vpop.f32.mrb[6].mxu1  ;;  %v4397_v17 = vpop.f32.mrb[10].mxu0  ;;  %v320_v18 = vadd.f32 %v3788_v13, %v3650_v3  ;;  %v838_v13 = vld [vmem:[#allocation2 + $0x228] sm:$0xff] }
 0x1d3   :  { %v3790_v19 = vpop.f32.mrb[7].mxu1  ;;  %v404_v20 = vpop.f32.mrb[11].mxu0 }
 0x1d4   :  { %v3791_v21 = vadd.f32 %v3790_v19, %v3789_v16  ;;  %v405_v22 = vadd.f32 %v404_v20, %v320_v18  ;;  %5203 = vmatprep.subr.bf16.mxu0 %v5202_v15  ;;  %v821_v16 = vld [vmem:[#allocation2 + $0x1a0] sm:$0xff]  ;;  %v839_v18 = vld [vmem:[#allocation2 + $0x230] sm:$0xff]  ;;  %v840_v19 = vld [vmem:[#allocation2 + $0x238] sm:$0xff] }
 0x1d5   :  { %5205 = vmatpush3.bf16.msra.mxu0 %v5202_v15 }
 0x1d6   :  { %v325_v23 = vadd.f32 %v3791_v21, %v3650_v3  ;;  %v5290_v3 = vpack.c.bf16 %v834_v62, %v833_v61  ;;  %v5302_v21 = vpack.c.bf16 %v840_v19, %v839_v18  ;;  %v3661_v19 = vld [vmem:[#allocation2 + $0x8a3] ss:$0 sm:$0xff] }
 0x1d8   :  { %v410_v24 = vadd.f32 %v4397_v17, %v325_v23  ;;  %5291 = vmatprep.subr.bf16.mxu1 %v5290_v3  ;;  %v822_v17 = vld [vmem:[#allocation2 + $0x1a8] sm:$0xff]  ;;  %v824_v23 = vld [vmem:[#allocation2 + $0x1b8] sm:$0xff] }
 0x1d9   :  { %v5300_v20 = vpack.c.bf16 %v822_v17, %v821_v16 }
 0x1da   :  { %v5206_v25 = vpack.c.bf16 %v410_v24, %v405_v22 }
 0x1dc   :  { %5207 = vmatprep.subr.bf16.mxu0 %v5206_v25 }
 0x1dd   :  { %5209 = vmatpush3.bf16.msra.mxu0 %v5206_v25  ;;  %v842_v25 = vld [vmem:[#allocation2 + $0x248] sm:$0xff] }
 0x1e0   :  { %4407 = vmatmul.mubr.msk.f32.vlgmr.msra.gmra.mrb[12].mxu0 %vm109_vm0, %v6042_v26 }
 0x1e1   :  { %4409 = vmatprep.mubr.msk.f32.mxu0 %vm109_vm0, %v6044_v27 }
 0x1e4   :  { %4410 = vmatmul.mubr.msk.f32.gmra.mrb[14].mxu0 %vm109_vm0, %v6050_v28 }
 0x1e5   :  { %4458 = vmatprep.mubr.msk.f32.mxu0 %vm109_vm0, %v6006_v34 }
 0x2b3   :  { %v4408_v29 = vpop.f32.mrb[12].mxu0 }
 0x2b4   :  { %v491_v30 = vpop.f32.mrb[13].mxu0 }
 0x2b5   :  { %4444 = vmatprep.mubr.f32.mxu1 %v491_v30 }
 0x2b6   :  { %4445 = vmatmul.mubr.f32.vlgmr.msra.gmra.mrb[8].mxu1 %v4408_v29 }
 0x2b7   :  { %v4411_v31 = vpop.f32.mrb[14].mxu0  ;;  %5293 = vmatpush3.bf16.msra.mxu1 %v5292_v8 }
 0x2b8   :  { %v501_v32 = vpop.f32.mrb[15].mxu0  ;;  %5295 = vmatprep.subr.bf16.mxu1 %v5294_v9 }
 0x2b9   :  { %4447 = vmatprep.mubr.f32.mxu1 %v501_v32  ;;  %v826_v32 = vld [vmem:[#allocation2 + $0x1c8] sm:$0xff] }
 0x2ba   :  { %4448 = vmatmul.mubr.f32.gmra.mrb[10].mxu1 %v4411_v31  ;;  %v825_v31 = vld [vmem:[#allocation2 + $0x1c0] sm:$0xff] }
 0x389   :  { %v4446_v33 = vpop.f32.mrb[8].mxu1 }
 0x38a   :  { %v6056_v35 = vsub.f32 %v400_v12, %v4446_v33  ;;  %v576_v36 = vpop.f32.mrb[9].mxu1  ;;  %v837_v12 = vld [vmem:[#allocation2 + $0x220] sm:$0xff]  ;;  %v843_v33 = vld [vmem:[#allocation2 + $0x250] sm:$0xff] }
 0x38b   :  { %v6058_v37 = vsub.f32 %v395_v14, %v576_v36  ;;  %v5296_v14 = vpack.c.bf16 %v820_v11, %v819_v10  ;;  %v5298_v15 = vpack.c.bf16 %v838_v13, %v837_v12  ;;  %v844_v36 = vld [vmem:[#allocation2 + $0x258] sm:$0xff]  ;;  %v3659_v11 = vld [vmem:[#allocation2 + $0x8a1] ss:$0 sm:$0xff] }
 0x38c   :  { %v600_v39 = vmul.f32 %v6056_v35, %v6056_v35 }
 0x38d   :  { %v599_v41 = vmul.f32 %v6058_v37, %v6058_v37  ;;  %v4449_v42 = vpop.f32.mrb[10].mxu1  ;;  %5297 = vmatpush3.bf16.msra.mxu1 %v5296_v14 }
 0x38e   :  { %v6064_v44 = vsub.f32 %v410_v24, %v4449_v42  ;;  %v586_v45 = vpop.f32.mrb[11].mxu1  ;;  %5299 = vmatprep.subr.bf16.mxu1 %v5298_v15  ;;  %v841_v24 = vld [vmem:[#allocation2 + $0x240] sm:$0xff]  ;;  %v827_v42 = vld [vmem:[#allocation2 + $0x1d0] sm:$0xff] }
 0x38f   :  { %v6066_v47 = vsub.f32 %v405_v22, %v586_v45  ;;  %v5242_v48 = vpack.c.bf16 %v600_v39, %v599_v41  ;;  %v823_v22 = vld [vmem:[#allocation2 + $0x1b0] sm:$0xff]  ;;  %v5306_v30 = vpack.c.bf16 %v842_v25, %v841_v24  ;;  %v5308_v39 = vpack.c.bf16 %v826_v32, %v825_v31  ;;  %v828_v45 = vld [vmem:[#allocation2 + $0x1d8] sm:$0xff]  ;;  %v3660_v15 = vld [vmem:[#allocation2 + $0x8a2] ss:$0 sm:$0xff] }
 0x390   :  { %v602_v50 = vmul.f32 %v6064_v44, %v6064_v44  ;;  %v5304_v29 = vpack.c.bf16 %v824_v23, %v823_v22  ;;  %v5310_v41 = vpack.c.bf16 %v844_v36, %v843_v33 }
 0x391   :  { %v601_v51 = vmul.f32 %v6066_v47, %v6066_v47  ;;  %5243 = vmatprep.subr.bf16.mxu0 %v5242_v48  ;;  %5301 = vmatpush3.bf16.msra.mxu1 %v5300_v20 }
 0x392   :  { %5245 = vmatpush3.bf16.msra.mxu0 %v5242_v48  ;;  %5303 = vmatprep.subr.bf16.mxu1 %v5302_v21  ;;  %v845_v48 = vld [vmem:[#allocation2 + $0x260] sm:$0xff] }
 0x393   :  { %v5246_v53 = vpack.c.bf16 %v602_v50, %v601_v51  ;;  %v846_v50 = vld [vmem:[#allocation2 + $0x268] sm:$0xff]  ;;  %v5312_v51 = vpack.c.bf16 %v828_v45, %v827_v42 }
 0x395   :  { %5247 = vmatprep.subr.bf16.mxu0 %v5246_v53  ;;  %5305 = vmatpush3.bf16.msra.mxu1 %v5304_v29 }
 0x396   :  { %5249 = vmatpush3.bf16.msra.mxu0 %v5246_v53  ;;  %5307 = vmatprep.subr.bf16.mxu1 %v5306_v30  ;;  %v5314_v53 = vpack.c.bf16 %v846_v50, %v845_v48  ;;  %v849_v50 = vld [vmem:[#allocation2 + $0x280] sm:$0xff] }
 0x397   :  { %5251 = vmatprep.subr.bf16.mxu0 %v6010_v38 }
 0x399   :  { %4459 = vmatmul.mubr.msk.f32.vlgmr.msra.gmra.mrb[16].mxu0 %vm109_vm0, %v6042_v26  ;;  %5309 = vmatpush3.bf16.msra.mxu1 %v5308_v39 }
 0x39a   :  { %4461 = vmatprep.mubr.msk.f32.mxu0 %vm109_vm0, %v6044_v27  ;;  %5253 = vmatpush3.bf16.msra.mxu0 %v6010_v38 }
 0x39b   :  { %5255 = vmatprep.subr.bf16.mxu0 %v6012_v40  ;;  %5311 = vmatprep.subr.bf16.mxu1 %v5310_v41 }
 0x39d   :  { %4462 = vmatmul.mubr.msk.f32.gmra.mrb[18].mxu0 %vm109_vm0, %v6050_v28  ;;  %5313 = vmatpush3.bf16.msra.mxu1 %v5312_v51  ;;  %v850_v51 = vld [vmem:[#allocation2 + $0x288] sm:$0xff] }
 0x39e   :  { %5257 = vmatpush3.bf16.msra.mxu0 %v6012_v40  ;;  %5315 = vmatprep.subr.bf16.mxu1 %v5314_v53  ;;  %v5322_v53 = vpack.c.bf16 %v850_v51, %v849_v50  ;;  %v3670_v50 = vld [vmem:[#allocation2 + $0x8a4] ss:$0 sm:$0xff] }
 0x39f   :  { %5259 = vmatprep.subr.bf16.mxu0 %v6017_v43 }
 0x3a2   :  { %5261 = vmatpush3.bf16.msra.mxu0 %v6017_v43 }
 0x3a3   :  { %5263 = vmatprep.subr.bf16.mxu0 %v6021_v46 }
 0x3a6   :  { %5265 = vmatpush3.bf16.msra.mxu0 %v6021_v46 }
 0x3a7   :  { %5267 = vmatprep.subr.bf16.mxu0 %v6025_v49 }
 0x3aa   :  { %5269 = vmatpush3.bf16.msra.mxu0 %v6025_v49 }
 0x3ab   :  { %5271 = vmatprep.subr.bf16.mxu0 %v6029_v52 }
 0x3ae   :  { %5273 = vmatpush3.bf16.msra.mxu0 %v6029_v52 }
 0x3af   :  { %5275 = vmatprep.subr.bf16.mxu0 %v6033_v55 }
 0x3b2   :  { %5277 = vmatpush3.bf16.msra.mxu0 %v6033_v55 }
 0x3b3   :  { %5279 = vmatprep.subr.bf16.mxu0 %v6037_v58 }
 0x3b6   :  { %5281 = vmatpush3.bf16.msra.mxu0 %v6037_v58 }
 0x46c   :  { %v4460_v54 = vpop.f32.mrb[16].mxu0 }
 0x46d   :  { %v669_v56 = vpop.f32.mrb[17].mxu0 }
 0x46e   :  { %4496 = vmatprep.mubr.f32.mxu0 %v669_v56  ;;  %v830_v56 = vld [vmem:[#allocation2 + $0x1e8] sm:$0xff] }
 0x46f   :  { %4497 = vmatmul.mubr.f32.vlgmr.msra.gmra.mrb[20].mxu0 %v4460_v54  ;;  %v829_v54 = vld [vmem:[#allocation2 + $0x1e0] sm:$0xff] }
 0x470   :  { %v4463_v57 = vpop.f32.mrb[18].mxu0 }
 0x471   :  { %v679_v59 = vpop.f32.mrb[19].mxu0 }
 0x472   :  { %4499 = vmatprep.mubr.f32.mxu0 %v679_v59  ;;  %v848_v59 = vld [vmem:[#allocation2 + $0x278] sm:$0xff] }
 0x473   :  { %4500 = vmatmul.mubr.f32.gmra.mrb[22].mxu0 %v4463_v57  ;;  %v847_v57 = vld [vmem:[#allocation2 + $0x270] sm:$0xff] }
 0x474   :  { %4510 = vmatprep.mubr.msk.f32.mxu0 %vm109_vm0, %v865_v60  ;;  %v5316_v60 = vpack.c.bf16 %v830_v56, %v829_v54  ;;  %v5318_v61 = vpack.c.bf16 %v848_v59, %v847_v57  ;;  %v851_v54 = vld [vmem:[#allocation2 + $0x290] sm:$0xff]  ;;  %v852_v56 = vld [vmem:[#allocation2 + $0x298] sm:$0xff]  ;;  %v866_v57 = vld [vmem:[#allocation2 + $0x7e8] sm:$0xff] }
 0x475   :  { %v867_v59 = vld [vmem:[#allocation2 + $0x7f0] sm:$0xff] }
 0x476   :  { %5317 = vmatpush3.bf16.msra.mxu1 %v5316_v60  ;;  %v853_v60 = vld [vmem:[#allocation2 + $0x2a0] sm:$0xff] }
 0x477   :  { %5319 = vmatprep.subr.bf16.mxu1 %v5318_v61  ;;  %v854_v61 = vld [vmem:[#allocation2 + $0x2a8] sm:$0xff] }
 0x542   :  { %v4498_v62 = vpop.f32.mrb[20].mxu0 }
 0x543   :  { %v760_v63 = vadd.f32 1e-05, %v4498_v62  ;;  %v754_v3 = vpop.f32.mrb[21].mxu0  ;;  %v869_v62 = vld [vmem:[#allocation2 + $0x800] sm:$0xff] }
 0x544   :  { %v755_v5 = vadd.f32 1e-05, %v754_v3  ;;  %v855_v3 = vld [vmem:[#allocation2 + $0x2b0] sm:$0xff] }
 0x545   :  { %5853 = vrsqrt.f32 %v760_v63  ;;  %v5330_v63 = vpack.c.bf16 %v854_v61, %v853_v60 }
 0x546   :  { %5855 = vrsqrt.f32 %v755_v5  ;;  %v4501_v6 = vpop.f32.mrb[22].mxu0  ;;  %v856_v5 = vld [vmem:[#allocation2 + $0x2b8] sm:$0xff] }
 0x547   :  { %v770_v7 = vadd.f32 1e-05, %v4501_v6  ;;  %v764_v8 = vpop.f32.mrb[23].mxu0  ;;  %v870_v6 = vld [vmem:[#allocation2 + $0x808] sm:$0xff] }
 0x548   :  { %v765_v9 = vadd.f32 1e-05, %v764_v8  ;;  %v5334_v8 = vpack.c.bf16 %v856_v5, %v855_v3 }
 0x549   :  { %5857 = vrsqrt.f32 %v770_v7  ;;  %v871_v7 = vld [vmem:[#allocation2 + $0x810] sm:$0xff] }
 0x54a   :  { %5859 = vrsqrt.f32 %v765_v9  ;;  %v857_v9 = vld [vmem:[#allocation2 + $0x2c0] sm:$0xff] }
 0x54f   :  { %v5854_v10 = vpop.eup %5853 }
 0x550   :  { %v5856_v12 = vpop.eup %5855  ;;  %v778_v13 = vmul.f32 %v5854_v10, %v6056_v35  ;;  %v858_v10 = vld [vmem:[#allocation2 + $0x2c8] sm:$0xff] }
 0x551   :  { %v777_v14 = vmul.f32 %v5856_v12, %v6058_v37  ;;  %v5338_v12 = vpack.c.bf16 %v858_v10, %v857_v9 }
 0x552   :  { %v786_v16 = vmul.f32 %v3659_v11, %v778_v13  ;;  %v859_v13 = vld [vmem:[#allocation2 + $0x2d0] sm:$0xff] }
 0x553   :  { %v5858_v17 = vpop.eup %5857  ;;  %v785_v18 = vmul.f32 %v3659_v11, %v777_v14  ;;  %v860_v14 = vld [vmem:[#allocation2 + $0x2d8] sm:$0xff] }
 0x554   :  { %v5860_v20 = vpop.eup %5859  ;;  %v780_v21 = vmul.f32 %v5858_v17, %v6064_v44  ;;  %v794_v22 = vadd.f32 %v3660_v15, %v786_v16  ;;  %v831_v16 = vld [vmem:[#allocation2 + $0x1f0] sm:$0xff]  ;;  %v832_v17 = vld [vmem:[#allocation2 + $0x1f8] sm:$0xff] }
 0x555   :  { %v779_v23 = vmul.f32 %v5860_v20, %v6066_v47  ;;  %v793_v24 = vadd.f32 %v3660_v15, %v785_v18  ;;  %v5320_v18 = vpack.c.bf16 %v832_v17, %v831_v16  ;;  %v862_v20 = vld [vmem:[#allocation2 + $0x2e8] sm:$0xff] }
 0x556   :  { %v788_v25 = vmul.f32 %v3659_v11, %v780_v21  ;;  %vm798_vm1 = vcmp.ge.f32.partialorder %v794_v22, 0.0  ;;  %v806_v29 = vmul.f32 %v3661_v19, %v794_v22 }
 0x557   :  { %v787_v30 = vmul.f32 %v3659_v11, %v779_v23  ;;  %vm797_vm2 = vcmp.ge.f32.partialorder %v793_v24, 0.0  ;;  %v805_v35 = vmul.f32 %v3661_v19, %v793_v24  ;;  %v872_v11 = vld [vmem:[#allocation2 + $0x818] sm:$0xff]  ;;  %5321 = vmatpush3.bf16.msra.mxu1 %v5320_v18 }
 0x558   :  { %v810_v31 = vsel %vm798_vm1, %v794_v22, %v806_v29  ;;  %v796_v37 = vadd.f32 %v3660_v15, %v788_v25  ;;  %v863_v22 = vld [vmem:[#allocation2 + $0x2f0] sm:$0xff]  ;;  %v864_v23 = vld [vmem:[#allocation2 + $0x2f8] sm:$0xff] }
 0x559   :  { %v809_v32 = vsel %vm797_vm2, %v793_v24, %v805_v35  ;;  %v6100_v33 = vadd.f32 %v810_v31, %v5978_v1  ;;  %v795_v36 = vadd.f32 %v3660_v15, %v787_v30  ;;  %v5342_v15 = vpack.c.bf16 %v860_v14, %v859_v13 }
 0x55a   :  { %v6103_v39 = vadd.f32 %v809_v32, %v5973_v0  ;;  %vm800_vm3 = vcmp.ge.f32.partialorder %v796_v37, 0.0  ;;  %v808_v44 = vmul.f32 %v3661_v19, %v796_v37  ;;  %v5350_v24 = vpack.c.bf16 %v864_v23, %v863_v22 }
 0x55b   :  { %vm799_vm4 = vcmp.ge.f32.partialorder %v795_v36, 0.0  ;;  %v807_v47 = vmul.f32 %v3661_v19, %v795_v36  ;;  %v861_v19 = vld [vmem:[#allocation2 + $0x2e0] sm:$0xff] }
 0x55c   :  { %v5282_v41 = vpack.c.bf16 %v6100_v33, %v6103_v39  ;;  %v812_v42 = vsel %vm800_vm3, %v796_v37, %v808_v44  ;;  %v5346_v21 = vpack.c.bf16 %v862_v20, %v861_v19 }
 0x55d   :  { %v811_v45 = vsel %vm799_vm4, %v795_v36, %v807_v47  ;;  %v6108_v48 = vadd.f32 %v812_v42, %v5990_v4  ;;  %v5326_v4 = vpack.c.bf16 %v852_v56, %v851_v54 }
 0x55e   :  { %5283 = vmatprep.subr.bf16.mxu0 %v5282_v41  ;;  %v6111_v1 = vadd.f32 %v811_v45, %v5983_v2  ;;  %v868_v2 = vld [vmem:[#allocation2 + $0x7f8] sm:$0xff] }
 0x55f   :  { %5285 = vmatpush3.bf16.msra.mxu0 %v5282_v41 }
 0x560   :  { %v5286_v0 = vpack.c.bf16 %v6108_v48, %v6111_v1 }
 0x562   :  { %5287 = vmatprep.subr.bf16.mxu0 %v5286_v0 }
 0x563   :  { %5289 = vmatpush3.bf16.msra.mxu0 %v5286_v0 }
 0x564   :  { %5323 = vmatprep.subr.bf16.mxu0 %v5322_v53 }
 0x566   :  { %4511 = vmatmul.mubr.msk.f32.vlgmr.msra.gmra.mrb[24].mxu0 %vm109_vm0, %v866_v57 }
 0x567   :  { %4513 = vmatprep.mubr.msk.f32.mxu0 %vm109_vm0, %v867_v59  ;;  %5325 = vmatpush3.bf16.msra.mxu0 %v5322_v53 }
 0x568   :  { %5327 = vmatprep.subr.bf16.mxu0 %v5326_v4 }
 0x56a   :  { %4514 = vmatmul.mubr.msk.f32.gmra.mrb[26].mxu0 %vm109_vm0, %v868_v2 }
 0x56b   :  { %4516 = vmatprep.mubr.msk.f32.mxu0 %vm109_vm0, %v869_v62  ;;  %5329 = vmatpush3.bf16.msra.mxu0 %v5326_v4 }
 0x56c   :  { %5331 = vmatprep.subr.bf16.mxu0 %v5330_v63 }
 0x56e   :  { %4517 = vmatmul.mubr.msk.f32.gmra.mrb[28].mxu0 %vm109_vm0, %v870_v6 }
 0x56f   :  { %4519 = vmatprep.mubr.msk.f32.mxu0 %vm109_vm0, %v871_v7  ;;  %5333 = vmatpush3.bf16.msra.mxu0 %v5330_v63 }
 0x570   :  { %5335 = vmatprep.subr.bf16.mxu0 %v5334_v8 }
 0x572   :  { %4520 = vmatmul.mubr.msk.f32.gmra.mrb[30].mxu0 %vm109_vm0, %v872_v11 }
 0x573   :  { %5337 = vmatpush3.bf16.msra.mxu0 %v5334_v8 }
 0x574   :  { %5339 = vmatprep.subr.bf16.mxu0 %v5338_v12 }
 0x577   :  { %5341 = vmatpush3.bf16.msra.mxu0 %v5338_v12 }
 0x578   :  { %5343 = vmatprep.subr.bf16.mxu0 %v5342_v15 }
 0x57b   :  { %5345 = vmatpush3.bf16.msra.mxu0 %v5342_v15 }
 0x57c   :  { %5347 = vmatprep.subr.bf16.mxu0 %v5346_v21 }
 0x57f   :  { %5349 = vmatpush3.bf16.msra.mxu0 %v5346_v21 }
 0x580   :  { %5351 = vmatprep.subr.bf16.mxu0 %v5350_v24 }
 0x583   :  { %5353 = vmatpush3.bf16.msra.mxu0 %v5350_v24 }
 0x584   :  { %5363 = vmatprep.subr.bf16.mxu0 %v6010_v38 }
 0x639   :  { %v4512_v25 = vpop.f32.mrb[24].mxu0 }
 0x63a   :  { %v967_v29 = vpop.f32.mrb[25].mxu0 }
 0x63b   :  { %1074 = vmatprep.mubr.f32.mxu1 %v967_v29 }
 0x63c   :  { %1075 = vmatmul.mubr.f32.vlgmr.msra.gmra.mrb[12].mxu1 %v6103_v39 }
 0x63d   :  { %v4515_v30 = vpop.f32.mrb[26].mxu0  ;;  %1079 = vmatprep.mubr.f32.mxu1 %v4512_v25 }
 0x63e   :  { %v977_v35 = vpop.f32.mrb[27].mxu0 }
 0x640   :  { %1080 = vmatmul.mubr.f32.gmra.mrb[14].mxu1 %v6100_v33 }
 0x641   :  { %v4518_v31 = vpop.f32.mrb[28].mxu0  ;;  %1084 = vmatprep.mubr.f32.mxu1 %v977_v35 }
 0x642   :  { %v987_v37 = vpop.f32.mrb[29].mxu0 }
 0x643   :  { %4554 = vmatprep.mubr.f32.mxu0 %v987_v37  ;;  %v1620_v37 = vld [vmem:[#allocation2 + $0x820] sm:$0xff] }
 0x644   :  { %1085 = vmatmul.mubr.f32.gmra.mrb[16].mxu1 %v6111_v1  ;;  %4555 = vmatmul.mubr.f32.vlgmr.msra.gmra.mrb[32].mxu0 %v4518_v31 }
 0x645   :  { %v4521_v32 = vpop.f32.mrb[30].mxu0  ;;  %1089 = vmatprep.mubr.f32.mxu1 %v4515_v30  ;;  %5365 = vmatpush3.bf16.msra.mxu0 %v6010_v38 }
 0x646   :  { %v997_v36 = vpop.f32.mrb[31].mxu0  ;;  %5367 = vmatprep.subr.bf16.mxu0 %v6012_v40 }
 0x647   :  { %4557 = vmatprep.mubr.f32.mxu0 %v997_v36  ;;  %v1605_v36 = vld [vmem:[#allocation2 + $0x408] sm:$0xff] }
 0x648   :  { %1090 = vmatmul.mubr.f32.gmra.mrb[18].mxu1 %v6108_v48  ;;  %4558 = vmatmul.mubr.f32.gmra.mrb[34].mxu0 %v4521_v32  ;;  %v1604_v32 = vld [vmem:[#allocation2 + $0x400] sm:$0xff] }
 0x649   :  { %4568 = vmatprep.mubr.msk.f32.mxu1 %vm109_vm0, %v6006_v34  ;;  %5369 = vmatpush3.bf16.msra.mxu0 %v6012_v40 }
 0x64a   :  { %5371 = vmatprep.subr.bf16.mxu0 %v6017_v43 }
 0x64d   :  { %5373 = vmatpush3.bf16.msra.mxu0 %v6017_v43 }
 0x64e   :  { %5375 = vmatprep.subr.bf16.mxu0 %v6021_v46 }
 0x651   :  { %5377 = vmatpush3.bf16.msra.mxu0 %v6021_v46 }
 0x652   :  { %5379 = vmatprep.subr.bf16.mxu0 %v6025_v49 }
 0x655   :  { %5381 = vmatpush3.bf16.msra.mxu0 %v6025_v49 }
 0x656   :  { %5383 = vmatprep.subr.bf16.mxu0 %v6029_v52 }
 0x659   :  { %5385 = vmatpush3.bf16.msra.mxu0 %v6029_v52 }
 0x65a   :  { %5387 = vmatprep.subr.bf16.mxu0 %v6033_v55 }
 0x65d   :  { %5389 = vmatpush3.bf16.msra.mxu0 %v6033_v55 }
 0x65e   :  { %5391 = vmatprep.subr.bf16.mxu0 %v6037_v58 }
 0x661   :  { %5393 = vmatpush3.bf16.msra.mxu0 %v6037_v58 }
 0x70f   :  { %v3912_v44 = vpop.f32.mrb[12].mxu1 }
 0x710   :  { %v3913_v47 = vpop.f32.mrb[13].mxu1 }
 0x711   :  { %v3914_v41 = vadd.f32 %v3913_v47, %v3912_v44  ;;  %v5474_v44 = vpack.c.bf16 %v1605_v36, %v1604_v32  ;;  %v1606_v47 = vld [vmem:[#allocation2 + $0x410] sm:$0xff] }
 0x713   :  { %v3915_v42 = vpop.f32.mrb[14].mxu1  ;;  %v1077_v56 = vadd.f32 %v3914_v41, %v3670_v50  ;;  %v1607_v41 = vld [vmem:[#allocation2 + $0x418] sm:$0xff] }
 0x714   :  { %v3916_v45 = vpop.f32.mrb[15].mxu1 }
 0x715   :  { %v3917_v51 = vadd.f32 %v3916_v45, %v3915_v42  ;;  %v5478_v42 = vpack.c.bf16 %v1607_v41, %v1606_v47  ;;  %v1608_v45 = vld [vmem:[#allocation2 + $0x420] sm:$0xff] }
 0x717   :  { %v3918_v0 = vpop.f32.mrb[16].mxu1  ;;  %v1082_v53 = vadd.f32 %v3917_v51, %v3670_v50  ;;  %v4556_v54 = vpop.f32.mrb[32].mxu0 }
 0x718   :  { %v3919_v57 = vpop.f32.mrb[17].mxu1  ;;  %v1161_v59 = vpop.f32.mrb[33].mxu0 }
 0x719   :  { %v1167_v4 = vadd.f32 %v4556_v54, %v1082_v53  ;;  %v3920_v60 = vadd.f32 %v3919_v57, %v3918_v0  ;;  %v1162_v61 = vadd.f32 %v1161_v59, %v1077_v56  ;;  %v1610_v0 = vld [vmem:[#allocation2 + $0x430] sm:$0xff]  ;;  %v1611_v53 = vld [vmem:[#allocation2 + $0x438] sm:$0xff]  ;;  %v1612_v56 = vld [vmem:[#allocation2 + $0x440] sm:$0xff] }
 0x71a   :  { %v5486_v54 = vpack.c.bf16 %v1611_v53, %v1610_v0  ;;  %v1613_v57 = vld [vmem:[#allocation2 + $0x448] sm:$0xff]  ;;  %v1590_v53 = vld [vmem:[#allocation2 + $0x390] sm:$0xff] }
 0x71b   :  { %v5354_v2 = vpack.c.bf16 %v1167_v4, %v1162_v61  ;;  %v3921_v62 = vpop.f32.mrb[18].mxu1  ;;  %v4559_v63 = vpop.f32.mrb[34].mxu0  ;;  %v1087_v3 = vadd.f32 %v3920_v60, %v3670_v50  ;;  %v5490_v59 = vpack.c.bf16 %v1613_v57, %v1612_v56  ;;  %v1615_v60 = vld [vmem:[#allocation2 + $0x458] sm:$0xff]  ;;  %v1573_v0 = vld [vmem:[#allocation2 + $0x308] sm:$0xff]  ;;  %v1622_v57 = vld [vmem:[#allocation2 + $0x830] sm:$0xff] }
 0x71c   :  { %v3922_v5 = vpop.f32.mrb[19].mxu1  ;;  %v1171_v6 = vpop.f32.mrb[35].mxu0  ;;  %v1621_v56 = vld [vmem:[#allocation2 + $0x828] sm:$0xff] }
 0x71d   :  { %v3923_v7 = vadd.f32 %v3922_v5, %v3921_v62  ;;  %v1172_v8 = vadd.f32 %v1171_v6, %v1087_v3  ;;  %5355 = vmatprep.subr.bf16.mxu1 %v5354_v2 }
 0x71e   :  { %5357 = vmatpush3.bf16.msra.mxu1 %v5354_v2 }
 0x71f   :  { %v1092_v9 = vadd.f32 %v3923_v7, %v3670_v50  ;;  %v1609_v50 = vld [vmem:[#allocation2 + $0x428] sm:$0xff] }
 0x720   :  { %v5482_v51 = vpack.c.bf16 %v1609_v50, %v1608_v45  ;;  %v1589_v45 = vld [vmem:[#allocation2 + $0x388] sm:$0xff] }
 0x721   :  { %v1177_v10 = vadd.f32 %v4559_v63, %v1092_v9 }
 0x723   :  { %v5358_v11 = vpack.c.bf16 %v1177_v10, %v1172_v8 }
 0x725   :  { %5359 = vmatprep.subr.bf16.mxu1 %v5358_v11 }
 0x726   :  { %5361 = vmatpush3.bf16.msra.mxu1 %v5358_v11 }
 0x729   :  { %4569 = vmatmul.mubr.msk.f32.vlgmr.msra.gmra.mrb[20].mxu1 %vm109_vm0, %v6042_v26 }
 0x72a   :  { %4571 = vmatprep.mubr.msk.f32.mxu1 %vm109_vm0, %v6044_v27 }
 0x72d   :  { %4572 = vmatmul.mubr.msk.f32.gmra.mrb[22].mxu1 %vm109_vm0, %v6050_v28 }
 0x72e   :  { %4620 = vmatprep.mubr.msk.f32.mxu1 %vm109_vm0, %v6006_v34 }
 0x7fc   :  { %v4570_v12 = vpop.f32.mrb[20].mxu1 }
 0x7fd   :  { %v1246_v13 = vpop.f32.mrb[21].mxu1 }
 0x7fe   :  { %4606 = vmatprep.mubr.f32.mxu0 %v1246_v13 }
 0x7ff   :  { %4607 = vmatmul.mubr.f32.vlgmr.msra.gmra.mrb[36].mxu0 %v4570_v12 }
 0x800   :  { %v4573_v14 = vpop.f32.mrb[22].mxu1 }
 0x801   :  { %v1256_v15 = vpop.f32.mrb[23].mxu1 }
 0x802   :  { %4609 = vmatprep.mubr.f32.mxu0 %v1256_v15 }
 0x803   :  { %4610 = vmatmul.mubr.f32.gmra.mrb[38].mxu0 %v4573_v14  ;;  %v3680_v14 = vld [vmem:[#allocation2 + $0x8a6] ss:$0 sm:$0xff] }
 0x804   :  { %4672 = vmatprep.mubr.msk.f32.mxu0 %vm109_vm0, %v1620_v37 }
 0x8d2   :  { %v4608_v16 = vpop.f32.mrb[36].mxu0 }
 0x8d3   :  { %v6152_v17 = vsub.f32 %v1167_v4, %v4608_v16  ;;  %v1331_v18 = vpop.f32.mrb[37].mxu0  ;;  %v1614_v4 = vld [vmem:[#allocation2 + $0x450] sm:$0xff] }
 0x8d4   :  { %v6154_v19 = vsub.f32 %v1162_v61, %v1331_v18  ;;  %v5494_v61 = vpack.c.bf16 %v1615_v60, %v1614_v4  ;;  %v1574_v4 = vld [vmem:[#allocation2 + $0x310] sm:$0xff]  ;;  %v1575_v60 = vld [vmem:[#allocation2 + $0x318] sm:$0xff] }
 0x8d5   :  { %v1355_v20 = vmul.f32 %v6152_v17, %v6152_v17 }
 0x8d6   :  { %v1354_v34 = vmul.f32 %v6154_v19, %v6154_v19  ;;  %v4611_v21 = vpop.f32.mrb[38].mxu0 }
 0x8d7   :  { %v6160_v22 = vsub.f32 %v1177_v10, %v4611_v21  ;;  %v1341_v23 = vpop.f32.mrb[39].mxu0  ;;  %v3679_v10 = vld [vmem:[#allocation2 + $0x8a5] ss:$0 sm:$0xff] }
 0x8d8   :  { %v6162_v24 = vsub.f32 %v1172_v8, %v1341_v23  ;;  %v5394_v25 = vpack.c.bf16 %v1355_v20, %v1354_v34  ;;  %v3681_v20 = vld [vmem:[#allocation2 + $0x8a7] ss:$0 sm:$0xff] }
 0x8d9   :  { %v1357_v29 = vmul.f32 %v6160_v22, %v6160_v22 }
 0x8da   :  { %v1356_v30 = vmul.f32 %v6162_v24, %v6162_v24  ;;  %5395 = vmatprep.subr.bf16.mxu1 %v5394_v25 }
 0x8db   :  { %5397 = vmatpush3.bf16.msra.mxu1 %v5394_v25 }
 0x8dc   :  { %v5398_v35 = vpack.c.bf16 %v1357_v29, %v1356_v30 }
 0x8de   :  { %5399 = vmatprep.subr.bf16.mxu1 %v5398_v35 }
 0x8df   :  { %5401 = vmatpush3.bf16.msra.mxu1 %v5398_v35 }
 0x8e0   :  { %5403 = vmatprep.subr.bf16.mxu1 %v6010_v38 }
 0x8e2   :  { %4621 = vmatmul.mubr.msk.f32.vlgmr.msra.gmra.mrb[24].mxu1 %vm109_vm0, %v6042_v26 }
 0x8e3   :  { %4623 = vmatprep.mubr.msk.f32.mxu1 %vm109_vm0, %v6044_v27  ;;  %5405 = vmatpush3.bf16.msra.mxu1 %v6010_v38 }
 0x8e4   :  { %5407 = vmatprep.subr.bf16.mxu1 %v6012_v40 }
 0x8e6   :  { %4624 = vmatmul.mubr.msk.f32.gmra.mrb[26].mxu1 %vm109_vm0, %v6050_v28 }
 0x8e7   :  { %5409 = vmatpush3.bf16.msra.mxu1 %v6012_v40 }
 0x8e8   :  { %5411 = vmatprep.subr.bf16.mxu1 %v6017_v43 }
 0x8eb   :  { %5413 = vmatpush3.bf16.msra.mxu1 %v6017_v43 }
 0x8ec   :  { %5415 = vmatprep.subr.bf16.mxu1 %v6021_v46 }
 0x8ef   :  { %5417 = vmatpush3.bf16.msra.mxu1 %v6021_v46 }
 0x8f0   :  { %5419 = vmatprep.subr.bf16.mxu1 %v6025_v49 }
 0x8f3   :  { %5421 = vmatpush3.bf16.msra.mxu1 %v6025_v49 }
 0x8f4   :  { %5423 = vmatprep.subr.bf16.mxu1 %v6029_v52 }
 0x8f7   :  { %5425 = vmatpush3.bf16.msra.mxu1 %v6029_v52 }
 0x8f8   :  { %5427 = vmatprep.subr.bf16.mxu1 %v6033_v55 }
 0x8fb   :  { %5429 = vmatpush3.bf16.msra.mxu1 %v6033_v55 }
 0x8fc   :  { %5431 = vmatprep.subr.bf16.mxu1 %v6037_v58 }
 0x8ff   :  { %5433 = vmatpush3.bf16.msra.mxu1 %v6037_v58 }
 0x900   :  { %5475 = vmatprep.subr.bf16.mxu1 %v5474_v44 }
 0x9b5   :  { %v4622_v26 = vpop.f32.mrb[24].mxu1 }
 0x9b6   :  { %v1424_v27 = vpop.f32.mrb[25].mxu1 }
 0x9b7   :  { %4658 = vmatprep.mubr.f32.mxu1 %v1424_v27 }
 0x9b8   :  { %4659 = vmatmul.mubr.f32.vlgmr.msra.gmra.mrb[28].mxu1 %v4622_v26 }
 0x9b9   :  { %v4625_v28 = vpop.f32.mrb[26].mxu1  ;;  %5477 = vmatpush3.bf16.msra.mxu1 %v5474_v44 }
 0x9ba   :  { %v1434_v31 = vpop.f32.mrb[27].mxu1  ;;  %5479 = vmatprep.subr.bf16.mxu1 %v5478_v42 }
 0x9bb   :  { %4661 = vmatprep.mubr.f32.mxu1 %v1434_v31 }
 0x9bc   :  { %4662 = vmatmul.mubr.f32.gmra.mrb[30].mxu1 %v4625_v28 }
 0x9bd   :  { %5481 = vmatpush3.bf16.msra.mxu1 %v5478_v42  ;;  %v1588_v42 = vld [vmem:[#allocation2 + $0x380] sm:$0xff] }
 0x9be   :  { %5483 = vmatprep.subr.bf16.mxu1 %v5482_v51  ;;  %v5442_v50 = vpack.c.bf16 %v1589_v45, %v1588_v42  ;;  %v1586_v45 = vld [vmem:[#allocation2 + $0x370] sm:$0xff] }
 0x9c1   :  { %5485 = vmatpush3.bf16.msra.mxu1 %v5482_v51  ;;  %v1572_v51 = vld [vmem:[#allocation2 + $0x300] sm:$0xff] }
 0x9c2   :  { %5487 = vmatprep.subr.bf16.mxu1 %v5486_v54 }
 0x9c5   :  { %5489 = vmatpush3.bf16.msra.mxu1 %v5486_v54  ;;  %v1591_v54 = vld [vmem:[#allocation2 + $0x398] sm:$0xff] }
 0x9c6   :  { %5491 = vmatprep.subr.bf16.mxu1 %v5490_v59 }
 0x9c9   :  { %5493 = vmatpush3.bf16.msra.mxu1 %v5490_v59  ;;  %v5446_v59 = vpack.c.bf16 %v1591_v54, %v1590_v53  ;;  %v1618_v54 = vld [vmem:[#allocation2 + $0x470] sm:$0xff] }
 0x9ca   :  { %5495 = vmatprep.subr.bf16.mxu1 %v5494_v61 }
 0x9cd   :  { %5497 = vmatpush3.bf16.msra.mxu1 %v5494_v61  ;;  %v1593_v61 = vld [vmem:[#allocation2 + $0x3a8] sm:$0xff] }
 0xa8b   :  { %v4660_v2 = vpop.f32.mrb[28].mxu1 }
 0xa8c   :  { %v1515_v62 = vadd.f32 1e-05, %v4660_v2  ;;  %v1509_v63 = vpop.f32.mrb[29].mxu1  ;;  %v1623_v2 = vld [vmem:[#allocation2 + $0x838] sm:$0xff] }
 0xa8d   :  { %v1510_v3 = vadd.f32 1e-05, %v1509_v63  ;;  %v1624_v63 = vld [vmem:[#allocation2 + $0x840] sm:$0xff] }
 0xa8e   :  { %5861 = vrsqrt.f32 %v1515_v62  ;;  %v5448_v62 = vpack.c.bf16 %v1575_v60, %v1574_v4 }
 0xa8f   :  { %5863 = vrsqrt.f32 %v1510_v3  ;;  %v4663_v5 = vpop.f32.mrb[30].mxu1 }
 0xa90   :  { %v1525_v6 = vadd.f32 1e-05, %v4663_v5  ;;  %v1519_v7 = vpop.f32.mrb[31].mxu1  ;;  %v1576_v5 = vld [vmem:[#allocation2 + $0x320] sm:$0xff] }
 0xa91   :  { %v1520_v8 = vadd.f32 1e-05, %v1519_v7  ;;  %v1594_v7 = vld [vmem:[#allocation2 + $0x3b0] sm:$0xff] }
 0xa92   :  { %5865 = vrsqrt.f32 %v1525_v6  ;;  %v1577_v6 = vld [vmem:[#allocation2 + $0x328] sm:$0xff] }
 0xa93   :  { %5867 = vrsqrt.f32 %v1520_v8  ;;  %v1595_v8 = vld [vmem:[#allocation2 + $0x3b8] sm:$0xff] }
 0xa98   :  { %v5862_v9 = vpop.eup %5861 }
 0xa99   :  { %v5864_v11 = vpop.eup %5863  ;;  %v1533_v12 = vmul.f32 %v5862_v9, %v6152_v17  ;;  %v1625_v9 = vld [vmem:[#allocation2 + $0x848] sm:$0xff] }
 0xa9a   :  { %v1532_v13 = vmul.f32 %v5864_v11, %v6154_v19  ;;  %v1626_v11 = vld [vmem:[#allocation2 + $0x850] sm:$0xff] }
 0xa9b   :  { %v1541_v15 = vmul.f32 %v3679_v10, %v1533_v12  ;;  %v5454_v12 = vpack.c.bf16 %v1595_v8, %v1594_v7 }
 0xa9c   :  { %v5866_v16 = vpop.eup %5865  ;;  %v1540_v18 = vmul.f32 %v3679_v10, %v1532_v13  ;;  %v1578_v13 = vld [vmem:[#allocation2 + $0x330] sm:$0xff] }
 0xa9d   :  { %v5868_v34 = vpop.eup %5867  ;;  %v1535_v21 = vmul.f32 %v5866_v16, %v6160_v22  ;;  %v1549_v23 = vadd.f32 %v3680_v14, %v1541_v15  ;;  %v1596_v15 = vld [vmem:[#allocation2 + $0x3c0] sm:$0xff]  ;;  %v1597_v16 = vld [vmem:[#allocation2 + $0x3c8] sm:$0xff] }
 0xa9e   :  { %v1534_v25 = vmul.f32 %v5868_v34, %v6162_v24  ;;  %v1548_v29 = vadd.f32 %v3680_v14, %v1540_v18  ;;  %v1627_v18 = vld [vmem:[#allocation2 + $0x858] sm:$0xff]  ;;  %v5458_v34 = vpack.c.bf16 %v1597_v16, %v1596_v15 }
 0xa9f   :  { %v1543_v30 = vmul.f32 %v3679_v10, %v1535_v21  ;;  %vm1553_vm5 = vcmp.ge.f32.partialorder %v1549_v23, 0.0  ;;  %v1561_v35 = vmul.f32 %v3681_v20, %v1549_v23  ;;  %v1580_v21 = vld [vmem:[#allocation2 + $0x340] sm:$0xff] }
 0xaa0   :  { %v1542_v26 = vmul.f32 %v3679_v10, %v1534_v25  ;;  %vm1552_vm6 = vcmp.ge.f32.partialorder %v1548_v29, 0.0  ;;  %v1560_v17 = vmul.f32 %v3681_v20, %v1548_v29  ;;  %v5452_v10 = vpack.c.bf16 %v1577_v6, %v1576_v5  ;;  %v1598_v25 = vld [vmem:[#allocation2 + $0x3d0] sm:$0xff] }
 0xaa1   :  { %v1565_v27 = vsel %vm1553_vm5, %v1549_v23, %v1561_v35  ;;  %v1551_v19 = vadd.f32 %v3680_v14, %v1543_v30  ;;  %v1581_v23 = vld [vmem:[#allocation2 + $0x348] sm:$0xff] }
 0xaa2   :  { %v1564_v28 = vsel %vm1552_vm6, %v1548_v29, %v1560_v17  ;;  %v6196_v31 = vadd.f32 %v1565_v27, %v6100_v33  ;;  %v1550_v37 = vadd.f32 %v3680_v14, %v1542_v26  ;;  %v1579_v14 = vld [vmem:[#allocation2 + $0x338] sm:$0xff]  ;;  %v5460_v30 = vpack.c.bf16 %v1581_v23, %v1580_v21  ;;  %v1582_v26 = vld [vmem:[#allocation2 + $0x350] sm:$0xff]  ;;  %v1600_v27 = vld [vmem:[#allocation2 + $0x3e0] sm:$0xff] }
 0xaa3   :  { %v6199_v32 = vadd.f32 %v1564_v28, %v6103_v39  ;;  %vm1555_vm7 = vcmp.ge.f32.partialorder %v1551_v19, 0.0  ;;  %v1563_v22 = vmul.f32 %v3681_v20, %v1551_v19  ;;  %v1599_v29 = vld [vmem:[#allocation2 + $0x3d8] sm:$0xff] }
 0xaa4   :  { %vm1554_vm8 = vcmp.ge.f32.partialorder %v1550_v37, 0.0  ;;  %v1562_v24 = vmul.f32 %v3681_v20, %v1550_v37  ;;  %v5456_v20 = vpack.c.bf16 %v1579_v14, %v1578_v13  ;;  %v5462_v35 = vpack.c.bf16 %v1599_v29, %v1598_v25  ;;  %v1583_v17 = vld [vmem:[#allocation2 + $0x358] sm:$0xff] }
 0xaa5   :  { %v5434_v36 = vpack.c.bf16 %v6196_v31, %v6199_v32  ;;  %v1567_v44 = vsel %vm1555_vm7, %v1551_v19, %v1563_v22  ;;  %v1601_v19 = vld [vmem:[#allocation2 + $0x3e8] sm:$0xff]  ;;  %v5464_v28 = vpack.c.bf16 %v1583_v17, %v1582_v26  ;;  %v1584_v22 = vld [vmem:[#allocation2 + $0x360] sm:$0xff] }
 0xaa6   :  { %v1566_v47 = vsel %vm1554_vm8, %v1550_v37, %v1562_v24  ;;  %v6204_v41 = vadd.f32 %v1567_v44, %v6108_v48  ;;  %v5444_v48 = vpack.c.bf16 %v1573_v0, %v1572_v51  ;;  %v5466_v37 = vpack.c.bf16 %v1601_v19, %v1600_v27  ;;  %v1585_v24 = vld [vmem:[#allocation2 + $0x368] sm:$0xff]  ;;  %v1603_v44 = vld [vmem:[#allocation2 + $0x3f8] sm:$0xff]  ;;  %v1616_v51 = vld [vmem:[#allocation2 + $0x460] sm:$0xff] }
 0xaa7   :  { %5435 = vmatprep.subr.bf16.mxu0 %v5434_v36  ;;  %v6207_v33 = vadd.f32 %v1566_v47, %v6111_v1  ;;  %v1592_v1 = vld [vmem:[#allocation2 + $0x3a0] sm:$0xff]  ;;  %v5468_v47 = vpack.c.bf16 %v1585_v24, %v1584_v22  ;;  %v1617_v0 = vld [vmem:[#allocation2 + $0x468] sm:$0xff]  ;;  %v6246_v22 = vld [vmem:[#allocation2 + $0x790] sm:$0xff] }
 0xaa8   :  { %5437 = vmatpush3.bf16.msra.mxu0 %v5434_v36  ;;  %v5450_v3 = vpack.c.bf16 %v1593_v61, %v1592_v1  ;;  %v1602_v36 = vld [vmem:[#allocation2 + $0x3f0] sm:$0xff]  ;;  %v5498_v53 = vpack.c.bf16 %v1617_v0, %v1616_v51  ;;  %v6250_v24 = vld [vmem:[#allocation2 + $0x798] sm:$0xff] }
 0xaa9   :  { %v5438_v39 = vpack.c.bf16 %v6204_v41, %v6207_v33  ;;  %v5470_v42 = vpack.c.bf16 %v1603_v44, %v1602_v36 }
 0xaaa   :  { %5499 = vmatprep.subr.bf16.mxu1 %v5498_v53 }
 0xaab   :  { %5439 = vmatprep.subr.bf16.mxu0 %v5438_v39  ;;  %5501 = vmatpush3.bf16.msra.mxu1 %v5498_v53 }
 0xaac   :  { %5441 = vmatpush3.bf16.msra.mxu0 %v5438_v39  ;;  %v1587_v39 = vld [vmem:[#allocation2 + $0x378] sm:$0xff] }
 0xaad   :  { %5443 = vmatprep.subr.bf16.mxu0 %v5442_v50  ;;  %v5472_v50 = vpack.c.bf16 %v1587_v39, %v1586_v45 }
 0xaaf   :  { %4673 = vmatmul.mubr.msk.f32.vlgmr.msra.gmra.mrb[40].mxu0 %vm109_vm0, %v1621_v56  ;;  %v1619_v56 = vld [vmem:[#allocation2 + $0x478] sm:$0xff] }
 0xab0   :  { %4675 = vmatprep.mubr.msk.f32.mxu0 %vm109_vm0, %v1622_v57  ;;  %5445 = vmatpush3.bf16.msra.mxu0 %v5444_v48  ;;  %v5502_v48 = vpack.c.bf16 %v1619_v56, %v1618_v54 }
 0xab1   :  { %5447 = vmatprep.subr.bf16.mxu0 %v5446_v59 }
 0xab2   :  { %5503 = vmatprep.subr.bf16.mxu1 %v5502_v48 }
 0xab3   :  { %4676 = vmatmul.mubr.msk.f32.gmra.mrb[42].mxu0 %vm109_vm0, %v1623_v2  ;;  %5505 = vmatpush3.bf16.msra.mxu1 %v5502_v48 }
 0xab4   :  { %4678 = vmatprep.mubr.msk.f32.mxu0 %vm109_vm0, %v1624_v63  ;;  %5449 = vmatpush3.bf16.msra.mxu0 %v5448_v62  ;;  %v6229_v63 = vld [vmem:[#allocation2 + $0x780] sm:$0xff] }
 0xab5   :  { %5451 = vmatprep.subr.bf16.mxu0 %v5450_v3 }
 0xab7   :  { %4679 = vmatmul.mubr.msk.f32.gmra.mrb[44].mxu0 %vm109_vm0, %v1625_v9  ;;  %v3690_v9 = vld [vmem:[#allocation2 + $0x8a8] ss:$0 sm:$0xff] }
 0xab8   :  { %4681 = vmatprep.mubr.msk.f32.mxu0 %vm109_vm0, %v1626_v11  ;;  %5453 = vmatpush3.bf16.msra.mxu0 %v5452_v10 }
 0xab9   :  { %5455 = vmatprep.subr.bf16.mxu0 %v5454_v12 }
 0xabb   :  { %4682 = vmatmul.mubr.msk.f32.gmra.mrb[46].mxu0 %vm109_vm0, %v1627_v18 }
 0xabc   :  { %5457 = vmatpush3.bf16.msra.mxu0 %v5456_v20 }
 0xabd   :  { %5459 = vmatprep.subr.bf16.mxu0 %v5458_v34 }
 0xac0   :  { %5461 = vmatpush3.bf16.msra.mxu0 %v5460_v30 }
 0xac1   :  { %5463 = vmatprep.subr.bf16.mxu0 %v5462_v35 }
 0xac4   :  { %5465 = vmatpush3.bf16.msra.mxu0 %v5464_v28 }
 0xac5   :  { %5467 = vmatprep.subr.bf16.mxu0 %v5466_v37  ;;  %v6242_v37 = vld [vmem:[#allocation2 + $0x788] sm:$0xff] }
 0xac8   :  { %5469 = vmatpush3.bf16.msra.mxu0 %v5468_v47 }
 0xac9   :  { %5471 = vmatprep.subr.bf16.mxu0 %v5470_v42 }
 0xacc   :  { %5473 = vmatpush3.bf16.msra.mxu0 %v5472_v50 }
 0xacd   :  { %5515 = vmatprep.subr.bf16.mxu0 %v6010_v38 }
 0xb82   :  { %v4674_v57 = vpop.f32.mrb[40].mxu0 }
 0xb83   :  { %v1722_v59 = vpop.f32.mrb[41].mxu0 }
 0xb84   :  { %1829 = vmatprep.mubr.f32.mxu0 %v1722_v59 }
 0xb85   :  { %1830 = vmatmul.mubr.f32.vlgmr.msra.gmra.mrb[48].mxu0 %v6199_v32 }
 0xb86   :  { %1834 = vmatprep.mubr.f32.mxu0 %v4674_v57  ;;  %v4677_v4 = vpop.f32.mrb[42].mxu0  ;;  %5517 = vmatpush3.bf16.msra.mxu0 %v6010_v38 }
 0xb87   :  { %v1732_v60 = vpop.f32.mrb[43].mxu0  ;;  %5519 = vmatprep.subr.bf16.mxu0 %v6012_v40 }
 0xb89   :  { %1835 = vmatmul.mubr.f32.gmra.mrb[50].mxu0 %v6196_v31 }
 0xb8a   :  { %v4680_v1 = vpop.f32.mrb[44].mxu0  ;;  %1839 = vmatprep.mubr.f32.mxu0 %v1732_v60  ;;  %5521 = vmatpush3.bf16.msra.mxu0 %v6012_v40 }
 0xb8b   :  { %v1742_v61 = vpop.f32.mrb[45].mxu0  ;;  %5523 = vmatprep.subr.bf16.mxu0 %v6017_v43 }
 0xb8c   :  { %4716 = vmatprep.mubr.f32.mxu1 %v1742_v61 }
 0xb8d   :  { %1840 = vmatmul.mubr.f32.gmra.mrb[52].mxu0 %v6207_v33  ;;  %4717 = vmatmul.mubr.f32.vlgmr.msra.gmra.mrb[32].mxu1 %v4680_v1 }
 0xb8e   :  { %v4683_v2 = vpop.f32.mrb[46].mxu0  ;;  %1844 = vmatprep.mubr.f32.mxu0 %v4677_v4  ;;  %5525 = vmatpush3.bf16.msra.mxu0 %v6017_v43 }
 0xb8f   :  { %v1752_v62 = vpop.f32.mrb[47].mxu0  ;;  %5527 = vmatprep.subr.bf16.mxu0 %v6021_v46 }
 0xb90   :  { %4719 = vmatprep.mubr.f32.mxu1 %v1752_v62 }
 0xb91   :  { %1845 = vmatmul.mubr.f32.gmra.mrb[54].mxu0 %v6204_v41  ;;  %4720 = vmatmul.mubr.f32.gmra.mrb[34].mxu1 %v4683_v2 }
 0xb92   :  { %4730 = vmatprep.mubr.msk.f32.mxu1 %vm109_vm0, %v6229_v63  ;;  %5529 = vmatpush3.bf16.msra.mxu0 %v6021_v46 }
 0xb93   :  { %5531 = vmatprep.subr.bf16.mxu0 %v6025_v49 }
 0xb96   :  { %5533 = vmatpush3.bf16.msra.mxu0 %v6025_v49 }
 0xb97   :  { %5535 = vmatprep.subr.bf16.mxu0 %v6029_v52 }
 0xb9a   :  { %5537 = vmatpush3.bf16.msra.mxu0 %v6029_v52 }
 0xb9b   :  { %5539 = vmatprep.subr.bf16.mxu0 %v6033_v55 }
 0xb9e   :  { %5541 = vmatpush3.bf16.msra.mxu0 %v6033_v55 }
 0xb9f   :  { %5543 = vmatprep.subr.bf16.mxu0 %v6037_v58 }
 0xba2   :  { %5545 = vmatpush3.bf16.msra.mxu0 %v6037_v58 }
 0xc58   :  { %v4044_v3 = vpop.f32.mrb[48].mxu0 }
 0xc59   :  { %v4045_v5 = vpop.f32.mrb[49].mxu0 }
 0xc5a   :  { %v4046_v6 = vadd.f32 %v4045_v5, %v4044_v3  ;;  %v2375_v5 = vld [vmem:[#allocation2 + $0x860] sm:$0xff] }
 0xc5c   :  { %v4047_v7 = vpop.f32.mrb[50].mxu0  ;;  %v1832_v14 = vadd.f32 %v4046_v6, %v3690_v9  ;;  %v2359_v6 = vld [vmem:[#allocation2 + $0x580] sm:$0xff] }
 0xc5d   :  { %v4048_v8 = vpop.f32.mrb[51].mxu0 }
 0xc5e   :  { %v4049_v10 = vadd.f32 %v4048_v8, %v4047_v7  ;;  %v2360_v7 = vld [vmem:[#allocation2 + $0x588] sm:$0xff] }
 0xc5f   :  { %v5626_v8 = vpack.c.bf16 %v2360_v7, %v2359_v6 }
 0xc60   :  { %v4050_v11 = vpop.f32.mrb[52].mxu0  ;;  %v1837_v12 = vadd.f32 %v4049_v10, %v3690_v9  ;;  %v4718_v13 = vpop.f32.mrb[32].mxu1  ;;  %v2362_v10 = vld [vmem:[#allocation2 + $0x598] sm:$0xff] }
 0xc61   :  { %v4051_v15 = vpop.f32.mrb[53].mxu0  ;;  %v1916_v16 = vpop.f32.mrb[33].mxu1 }
 0xc62   :  { %v1922_v18 = vadd.f32 %v4718_v13, %v1837_v12  ;;  %v4052_v20 = vadd.f32 %v4051_v15, %v4050_v11  ;;  %v1917_v34 = vadd.f32 %v1916_v16, %v1832_v14  ;;  %v2363_v12 = vld [vmem:[#allocation2 + $0x5a0] sm:$0xff]  ;;  %v2364_v13 = vld [vmem:[#allocation2 + $0x5a8] sm:$0xff]  ;;  %v2365_v15 = vld [vmem:[#allocation2 + $0x5b0] sm:$0xff] }
 0xc63   :  { %v5634_v14 = vpack.c.bf16 %v2364_v13, %v2363_v12  ;;  %v2366_v16 = vld [vmem:[#allocation2 + $0x5b8] sm:$0xff] }
 0xc64   :  { %v5506_v21 = vpack.c.bf16 %v1922_v18, %v1917_v34  ;;  %v4053_v23 = vpop.f32.mrb[54].mxu0  ;;  %v4721_v25 = vpop.f32.mrb[34].mxu1  ;;  %v1842_v29 = vadd.f32 %v4052_v20, %v3690_v9  ;;  %v2367_v20 = vld [vmem:[#allocation2 + $0x5c0] sm:$0xff] }
 0xc65   :  { %v4054_v30 = vpop.f32.mrb[55].mxu0  ;;  %v1926_v35 = vpop.f32.mrb[35].mxu1 }
 0xc66   :  { %v4055_v26 = vadd.f32 %v4054_v30, %v4053_v23  ;;  %v1927_v17 = vadd.f32 %v1926_v35, %v1842_v29  ;;  %5507 = vmatprep.subr.bf16.mxu1 %v5506_v21  ;;  %v2369_v23 = vld [vmem:[#allocation2 + $0x5d0] sm:$0xff] }
 0xc67   :  { %5509 = vmatpush3.bf16.msra.mxu1 %v5506_v21 }
 0xc68   :  { %v1847_v27 = vadd.f32 %v4055_v26, %v3690_v9  ;;  %v2361_v9 = vld [vmem:[#allocation2 + $0x590] sm:$0xff] }
 0xc69   :  { %v5630_v11 = vpack.c.bf16 %v2362_v10, %v2361_v9 }
 0xc6a   :  { %v1932_v19 = vadd.f32 %v4721_v25, %v1847_v27  ;;  %v2370_v25 = vld [vmem:[#allocation2 + $0x5d8] sm:$0xff] }
 0xc6b   :  { %v5646_v29 = vpack.c.bf16 %v2370_v25, %v2369_v23  ;;  %v2346_v23 = vld [vmem:[#allocation2 + $0x518] sm:$0xff]  ;;  %v2376_v25 = vld [vmem:[#allocation2 + $0x868] sm:$0xff] }
 0xc6c   :  { %v5510_v28 = vpack.c.bf16 %v1932_v19, %v1927_v17 }
 0xc6e   :  { %5511 = vmatprep.subr.bf16.mxu1 %v5510_v28 }
 0xc6f   :  { %5513 = vmatpush3.bf16.msra.mxu1 %v5510_v28 }
 0xc72   :  { %4731 = vmatmul.mubr.msk.f32.vlgmr.msra.gmra.mrb[36].mxu1 %vm109_vm0, %v6242_v37 }
 0xc73   :  { %4733 = vmatprep.mubr.msk.f32.mxu1 %vm109_vm0, %v6246_v22 }
 0xc76   :  { %4734 = vmatmul.mubr.msk.f32.gmra.mrb[38].mxu1 %vm109_vm0, %v6250_v24 }
 0xc77   :  { %4782 = vmatprep.mubr.msk.f32.mxu1 %vm109_vm0, %v6229_v63 }
 0xd45   :  { %v4732_v36 = vpop.f32.mrb[36].mxu1 }
 0xd46   :  { %v2001_v44 = vpop.f32.mrb[37].mxu1 }
 0xd47   :  { %4768 = vmatprep.mubr.f32.mxu0 %v2001_v44 }
 0xd48   :  { %4769 = vmatmul.mubr.f32.vlgmr.msra.gmra.mrb[56].mxu0 %v4732_v36 }
 0xd49   :  { %v4735_v47 = vpop.f32.mrb[38].mxu1 }
 0xd4a   :  { %v2011_v42 = vpop.f32.mrb[39].mxu1 }
 0xd4b   :  { %4771 = vmatprep.mubr.f32.mxu0 %v2011_v42 }
 0xd4c   :  { %4772 = vmatmul.mubr.f32.gmra.mrb[58].mxu0 %v4735_v47  ;;  %v3699_v47 = vld [vmem:[#allocation2 + $0x8a9] ss:$0 sm:$0xff] }
 0xd4d   :  { %4834 = vmatprep.mubr.msk.f32.mxu0 %vm109_vm0, %v2375_v5 }
 0xe1b   :  { %v4770_v45 = vpop.f32.mrb[56].mxu0 }
 0xe1c   :  { %v6256_v39 = vsub.f32 %v1922_v18, %v4770_v45  ;;  %v2086_v50 = vpop.f32.mrb[57].mxu0  ;;  %v5638_v18 = vpack.c.bf16 %v2366_v16, %v2365_v15  ;;  %v2343_v15 = vld [vmem:[#allocation2 + $0x500] sm:$0xff]  ;;  %v2344_v16 = vld [vmem:[#allocation2 + $0x508] sm:$0xff] }
 0xe1d   :  { %v6258_v51 = vsub.f32 %v1917_v34, %v2086_v50  ;;  %v2368_v34 = vld [vmem:[#allocation2 + $0x5c8] sm:$0xff] }
 0xe1e   :  { %v2110_v0 = vmul.f32 %v6256_v39, %v6256_v39  ;;  %v5642_v21 = vpack.c.bf16 %v2368_v34, %v2367_v20  ;;  %v2327_v20 = vld [vmem:[#allocation2 + $0x480] sm:$0xff]  ;;  %v2328_v34 = vld [vmem:[#allocation2 + $0x488] sm:$0xff] }
 0xe1f   :  { %v2109_v53 = vmul.f32 %v6258_v51, %v6258_v51  ;;  %v4773_v54 = vpop.f32.mrb[58].mxu0 }
 0xe20   :  { %v6264_v56 = vsub.f32 %v1932_v19, %v4773_v54  ;;  %v2096_v48 = vpop.f32.mrb[59].mxu0 }
 0xe21   :  { %v6266_v57 = vsub.f32 %v1927_v17, %v2096_v48  ;;  %v5546_v59 = vpack.c.bf16 %v2110_v0, %v2109_v53  ;;  %v3700_v0 = vld [vmem:[#allocation2 + $0x8aa] ss:$0 sm:$0xff]  ;;  %v3701_v48 = vld [vmem:[#allocation2 + $0x8ab] ss:$0 sm:$0xff] }
 0xe22   :  { %v2112_v4 = vmul.f32 %v6264_v56, %v6264_v56 }
 0xe23   :  { %v2111_v60 = vmul.f32 %v6266_v57, %v6266_v57  ;;  %5547 = vmatprep.subr.bf16.mxu1 %v5546_v59 }
 0xe24   :  { %5549 = vmatpush3.bf16.msra.mxu1 %v5546_v59 }
 0xe25   :  { %v5550_v1 = vpack.c.bf16 %v2112_v4, %v2111_v60 }
 0xe27   :  { %5551 = vmatprep.subr.bf16.mxu1 %v5550_v1 }
 0xe28   :  { %5553 = vmatpush3.bf16.msra.mxu1 %v5550_v1 }
 0xe29   :  { %5555 = vmatprep.subr.bf16.mxu1 %v6010_v38 }
 0xe2b   :  { %4783 = vmatmul.mubr.msk.f32.vlgmr.msra.gmra.mrb[40].mxu1 %vm109_vm0, %v6242_v37 }
 0xe2c   :  { %4785 = vmatprep.mubr.msk.f32.mxu1 %vm109_vm0, %v6246_v22  ;;  %5557 = vmatpush3.bf16.msra.mxu1 %v6010_v38 }
 0xe2d   :  { %5559 = vmatprep.subr.bf16.mxu1 %v6012_v40 }
 0xe2f   :  { %4786 = vmatmul.mubr.msk.f32.gmra.mrb[42].mxu1 %vm109_vm0, %v6250_v24 }
 0xe30   :  { %5561 = vmatpush3.bf16.msra.mxu1 %v6012_v40 }
 0xe31   :  { %5563 = vmatprep.subr.bf16.mxu1 %v6017_v43 }
 0xe34   :  { %5565 = vmatpush3.bf16.msra.mxu1 %v6017_v43 }
 0xe35   :  { %5567 = vmatprep.subr.bf16.mxu1 %v6021_v46 }
 0xe38   :  { %5569 = vmatpush3.bf16.msra.mxu1 %v6021_v46 }
 0xe39   :  { %5571 = vmatprep.subr.bf16.mxu1 %v6025_v49 }
 0xe3c   :  { %5573 = vmatpush3.bf16.msra.mxu1 %v6025_v49 }
 0xe3d   :  { %5575 = vmatprep.subr.bf16.mxu1 %v6029_v52 }
 0xe40   :  { %5577 = vmatpush3.bf16.msra.mxu1 %v6029_v52 }
 0xe41   :  { %5579 = vmatprep.subr.bf16.mxu1 %v6033_v55 }
 0xe44   :  { %5581 = vmatpush3.bf16.msra.mxu1 %v6033_v55 }
 0xe45   :  { %5583 = vmatprep.subr.bf16.mxu1 %v6037_v58 }
 0xe48   :  { %5585 = vmatpush3.bf16.msra.mxu1 %v6037_v58 }
 0xe49   :  { %5627 = vmatprep.subr.bf16.mxu1 %v5626_v8 }
 0xefe   :  { %v4784_v61 = vpop.f32.mrb[40].mxu1 }
 0xeff   :  { %v2179_v2 = vpop.f32.mrb[41].mxu1 }
 0xf00   :  { %4820 = vmatprep.mubr.f32.mxu1 %v2179_v2 }
 0xf01   :  { %4821 = vmatmul.mubr.f32.vlgmr.msra.gmra.mrb[44].mxu1 %v4784_v61 }
 0xf02   :  { %v4787_v62 = vpop.f32.mrb[42].mxu1  ;;  %5629 = vmatpush3.bf16.msra.mxu1 %v5626_v8 }
 0xf03   :  { %v2189_v3 = vpop.f32.mrb[43].mxu1  ;;  %5631 = vmatprep.subr.bf16.mxu1 %v5630_v11 }
 0xf04   :  { %4823 = vmatprep.mubr.f32.mxu1 %v2189_v3 }
 0xf05   :  { %4824 = vmatmul.mubr.f32.gmra.mrb[46].mxu1 %v4787_v62 }
 0xf06   :  { %5633 = vmatpush3.bf16.msra.mxu1 %v5630_v11 }
 0xf07   :  { %5635 = vmatprep.subr.bf16.mxu1 %v5634_v14 }
 0xf0a   :  { %5637 = vmatpush3.bf16.msra.mxu1 %v5634_v14 }
 0xf0b   :  { %5639 = vmatprep.subr.bf16.mxu1 %v5638_v18 }
 0xf0e   :  { %5641 = vmatpush3.bf16.msra.mxu1 %v5638_v18  ;;  %v5594_v18 = vpack.c.bf16 %v2344_v16, %v2343_v15  ;;  %v2340_v15 = vld [vmem:[#allocation2 + $0x4e8] sm:$0xff]  ;;  %v2357_v16 = vld [vmem:[#allocation2 + $0x570] sm:$0xff] }
 0xf0f   :  { %5643 = vmatprep.subr.bf16.mxu1 %v5642_v21 }
 0xf12   :  { %5645 = vmatpush3.bf16.msra.mxu1 %v5642_v21  ;;  %v2345_v21 = vld [vmem:[#allocation2 + $0x510] sm:$0xff] }
 0xf13   :  { %5647 = vmatprep.subr.bf16.mxu1 %v5646_v29 }
 0xf16   :  { %5649 = vmatpush3.bf16.msra.mxu1 %v5646_v29  ;;  %v2377_v29 = vld [vmem:[#allocation2 + $0x870] sm:$0xff] }
 0xfd4   :  { %v4822_v30 = vpop.f32.mrb[44].mxu1 }
 0xfd5   :  { %v2270_v35 = vadd.f32 1e-05, %v4822_v30  ;;  %v2264_v26 = vpop.f32.mrb[45].mxu1  ;;  %v5598_v30 = vpack.c.bf16 %v2346_v23, %v2345_v21  ;;  %v2342_v21 = vld [vmem:[#allocation2 + $0x4f8] sm:$0xff] }
 0xfd6   :  { %v2265_v17 = vadd.f32 1e-05, %v2264_v26  ;;  %v2330_v26 = vld [vmem:[#allocation2 + $0x498] sm:$0xff] }
 0xfd7   :  { %5869 = vrsqrt.f32 %v2270_v35  ;;  %v2329_v35 = vld [vmem:[#allocation2 + $0x490] sm:$0xff] }
 0xfd8   :  { %5871 = vrsqrt.f32 %v2265_v17  ;;  %v4825_v27 = vpop.f32.mrb[46].mxu1  ;;  %v2348_v17 = vld [vmem:[#allocation2 + $0x528] sm:$0xff] }
 0xfd9   :  { %v2280_v19 = vadd.f32 1e-05, %v4825_v27  ;;  %v2274_v28 = vpop.f32.mrb[47].mxu1  ;;  %v2378_v27 = vld [vmem:[#allocation2 + $0x878] sm:$0xff] }
 0xfda   :  { %v2275_v36 = vadd.f32 1e-05, %v2274_v28  ;;  %v2379_v28 = vld [vmem:[#allocation2 + $0x880] sm:$0xff] }
 0xfdb   :  { %5873 = vrsqrt.f32 %v2280_v19  ;;  %v5600_v19 = vpack.c.bf16 %v2330_v26, %v2329_v35  ;;  %v2374_v35 = vld [vmem:[#allocation2 + $0x5f8] sm:$0xff] }
 0xfdc   :  { %5875 = vrsqrt.f32 %v2275_v36 }
 0xfe1   :  { %v5870_v44 = vpop.eup %5869 }
 0xfe2   :  { %v5872_v42 = vpop.eup %5871  ;;  %v2288_v45 = vmul.f32 %v5870_v44, %v6256_v39  ;;  %v2331_v44 = vld [vmem:[#allocation2 + $0x4a0] sm:$0xff] }
 0xfe3   :  { %v2287_v50 = vmul.f32 %v5872_v42, %v6258_v51  ;;  %v2349_v42 = vld [vmem:[#allocation2 + $0x530] sm:$0xff] }
 0xfe4   :  { %v2296_v53 = vmul.f32 %v3699_v47, %v2288_v45  ;;  %v2350_v45 = vld [vmem:[#allocation2 + $0x538] sm:$0xff] }
 0xfe5   :  { %v5874_v54 = vpop.eup %5873  ;;  %v2295_v59 = vmul.f32 %v3699_v47, %v2287_v50  ;;  %v2380_v50 = vld [vmem:[#allocation2 + $0x888] sm:$0xff] }
 0xfe6   :  { %v5876_v4 = vpop.eup %5875  ;;  %v2290_v60 = vmul.f32 %v5874_v54, %v6264_v56  ;;  %v2304_v1 = vadd.f32 %v3700_v0, %v2296_v53  ;;  %v2381_v53 = vld [vmem:[#allocation2 + $0x890] sm:$0xff]  ;;  %v5606_v54 = vpack.c.bf16 %v2350_v45, %v2349_v42  ;;  %v3710_v45 = vld [vmem:[#allocation2 + $0x8ac] ss:$0 sm:$0xff] }
 0xfe7   :  { %v2289_v61 = vmul.f32 %v5876_v4, %v6266_v57  ;;  %v2303_v2 = vadd.f32 %v3700_v0, %v2295_v59  ;;  %v2334_v59 = vld [vmem:[#allocation2 + $0x4b8] sm:$0xff]  ;;  %v2351_v4 = vld [vmem:[#allocation2 + $0x540] sm:$0xff] }
 0xfe8   :  { %vm2308_vm9 = vcmp.ge.f32.partialorder %v2304_v1, 0.0  ;;  %v2316_v62 = vmul.f32 %v3701_v48, %v2304_v1  ;;  %v2298_v3 = vmul.f32 %v3699_v47, %v2290_v60  ;;  %v2352_v60 = vld [vmem:[#allocation2 + $0x548] sm:$0xff] }
 0xfe9   :  { %vm2307_vm10 = vcmp.ge.f32.partialorder %v2303_v2, 0.0  ;;  %v2315_v5 = vmul.f32 %v3701_v48, %v2303_v2  ;;  %v2297_v39 = vmul.f32 %v3699_v47, %v2289_v61  ;;  %v2332_v47 = vld [vmem:[#allocation2 + $0x4a8] sm:$0xff] }
 0xfea   :  { %v2320_v6 = vsel %vm2308_vm9, %v2304_v1, %v2316_v62  ;;  %v2306_v51 = vadd.f32 %v3700_v0, %v2298_v3  ;;  %v2382_v1 = vld [vmem:[#allocation2 + $0x898] sm:$0xff]  ;;  %v2335_v62 = vld [vmem:[#allocation2 + $0x4c0] sm:$0xff]  ;;  %v2336_v3 = vld [vmem:[#allocation2 + $0x4c8] sm:$0xff] }
 0xfeb   :  { %v2319_v7 = vsel %vm2307_vm10, %v2303_v2, %v2315_v5  ;;  %v6300_v8 = vadd.f32 %v2320_v6, %v6196_v31  ;;  %v2305_v9 = vadd.f32 %v3700_v0, %v2297_v39  ;;  %v5604_v0 = vpack.c.bf16 %v2332_v47, %v2331_v44  ;;  %v2353_v5 = vld [vmem:[#allocation2 + $0x550] sm:$0xff]  ;;  %v2354_v39 = vld [vmem:[#allocation2 + $0x558] sm:$0xff] }
 0xfec   :  { %v6303_v10 = vadd.f32 %v2319_v7, %v6199_v32  ;;  %vm2310_vm11 = vcmp.ge.f32.partialorder %v2306_v51, 0.0  ;;  %v2318_v56 = vmul.f32 %v3701_v48, %v2306_v51  ;;  %v5610_v2 = vpack.c.bf16 %v2352_v60, %v2351_v4  ;;  %v2337_v7 = vld [vmem:[#allocation2 + $0x4d0] sm:$0xff] }
 0xfed   :  { %vm2309_vm12 = vcmp.ge.f32.partialorder %v2305_v9, 0.0  ;;  %v2317_v57 = vmul.f32 %v3701_v48, %v2305_v9  ;;  %v2333_v48 = vld [vmem:[#allocation2 + $0x4b0] sm:$0xff]  ;;  %v5612_v6 = vpack.c.bf16 %v2336_v3, %v2335_v62 }
 0xfee   :  { %v5586_v11 = vpack.c.bf16 %v6300_v8, %v6303_v10  ;;  %v2322_v12 = vsel %vm2310_vm11, %v2306_v51, %v2318_v56  ;;  %v5608_v61 = vpack.c.bf16 %v2334_v59, %v2333_v48  ;;  %v5614_v51 = vpack.c.bf16 %v2354_v39, %v2353_v5  ;;  %v2355_v56 = vld [vmem:[#allocation2 + $0x560] sm:$0xff] }
 0xfef   :  { %v2321_v13 = vsel %vm2309_vm12, %v2305_v9, %v2317_v57  ;;  %v6308_v14 = vadd.f32 %v2322_v12, %v6204_v41  ;;  %v5596_v41 = vpack.c.bf16 %v2328_v34, %v2327_v20  ;;  %v2338_v9 = vld [vmem:[#allocation2 + $0x4d8] sm:$0xff]  ;;  %v2356_v57 = vld [vmem:[#allocation2 + $0x568] sm:$0xff]  ;;  %v2341_v34 = vld [vmem:[#allocation2 + $0x4f0] sm:$0xff] }
 0xff0   :  { %5587 = vmatprep.subr.bf16.mxu0 %v5586_v11  ;;  %v6311_v31 = vadd.f32 %v2321_v13, %v6207_v33  ;;  %v2347_v33 = vld [vmem:[#allocation2 + $0x520] sm:$0xff]  ;;  %v5618_v12 = vpack.c.bf16 %v2356_v57, %v2355_v56  ;;  %v5624_v23 = vpack.c.bf16 %v2342_v21, %v2341_v34 }
 0xff1   :  { %5589 = vmatpush3.bf16.msra.mxu0 %v5586_v11  ;;  %v5602_v36 = vpack.c.bf16 %v2348_v17, %v2347_v33  ;;  %v5616_v11 = vpack.c.bf16 %v2338_v9, %v2337_v7  ;;  %v2339_v13 = vld [vmem:[#allocation2 + $0x4e0] sm:$0xff] }
 0xff2   :  { %v5590_v32 = vpack.c.bf16 %v6308_v14, %v6311_v31 }
 0xff4   :  { %5591 = vmatprep.subr.bf16.mxu0 %v5590_v32 }
 0xff5   :  { %5593 = vmatpush3.bf16.msra.mxu0 %v5590_v32  ;;  %v2358_v32 = vld [vmem:[#allocation2 + $0x578] sm:$0xff] }
 0xff6   :  { %5595 = vmatprep.subr.bf16.mxu0 %v5594_v18  ;;  %v5620_v18 = vpack.c.bf16 %v2340_v15, %v2339_v13  ;;  %v5622_v20 = vpack.c.bf16 %v2358_v32, %v2357_v16 }
 0xff8   :  { %4835 = vmatmul.mubr.msk.f32.vlgmr.msra.gmra.mrb[60].mxu0 %vm109_vm0, %v2376_v25  ;;  %v2371_v25 = vld [vmem:[#allocation2 + $0x5e0] sm:$0xff] }
 0xff9   :  { %4837 = vmatprep.mubr.msk.f32.mxu0 %vm109_vm0, %v2377_v29  ;;  %5597 = vmatpush3.bf16.msra.mxu0 %v5596_v41  ;;  %v2372_v41 = vld [vmem:[#allocation2 + $0x5e8] sm:$0xff] }
 0xffa   :  { %5599 = vmatprep.subr.bf16.mxu0 %v5598_v30  ;;  %v5650_v29 = vpack.c.bf16 %v2372_v41, %v2371_v25  ;;  %v2373_v30 = vld [vmem:[#allocation2 + $0x5f0] sm:$0xff] }
 0xffb   :  { %v5654_v26 = vpack.c.bf16 %v2374_v35, %v2373_v30 }
 0xffc   :  { %4838 = vmatmul.mubr.msk.f32.gmra.mrb[62].mxu0 %vm109_vm0, %v2378_v27  ;;  %5651 = vmatprep.subr.bf16.mxu1 %v5650_v29 }
 0xffd   :  { %4840 = vmatprep.mubr.msk.f32.mxu0 %vm109_vm0, %v2379_v28  ;;  %5601 = vmatpush3.bf16.msra.mxu0 %v5600_v19 }
 0xffe   :  { %5603 = vmatprep.subr.bf16.mxu0 %v5602_v36  ;;  %5653 = vmatpush3.bf16.msra.mxu1 %v5650_v29 }
 0xfff   :  { %5655 = vmatprep.subr.bf16.mxu1 %v5654_v26 }
0x1000   :  { %4841 = vmatmul.mubr.msk.f32.gmra.mrb[64].mxu0 %vm109_vm0, %v2380_v50 }
0x1001   :  { %4843 = vmatprep.mubr.msk.f32.mxu0 %vm109_vm0, %v2381_v53  ;;  %5605 = vmatpush3.bf16.msra.mxu0 %v5604_v0 }
0x1002   :  { %5607 = vmatprep.subr.bf16.mxu0 %v5606_v54  ;;  %5657 = vmatpush3.bf16.msra.mxu1 %v5654_v26 }
0x1003   :  { %5667 = vmatprep.subr.bf16.mxu1 %v6010_v38 }
0x1004   :  { %4844 = vmatmul.mubr.msk.f32.gmra.mrb[66].mxu0 %vm109_vm0, %v2382_v1 }
0x1005   :  { %5609 = vmatpush3.bf16.msra.mxu0 %v5608_v61 }
0x1006   :  { %5611 = vmatprep.subr.bf16.mxu0 %v5610_v2 }
0x1009   :  { %5613 = vmatpush3.bf16.msra.mxu0 %v5612_v6 }
0x100a   :  { %5615 = vmatprep.subr.bf16.mxu0 %v5614_v51 }
0x100d   :  { %5617 = vmatpush3.bf16.msra.mxu0 %v5616_v11 }
0x100e   :  { %5619 = vmatprep.subr.bf16.mxu0 %v5618_v12 }
0x1011   :  { %5621 = vmatpush3.bf16.msra.mxu0 %v5620_v18 }
0x1012   :  { %5623 = vmatprep.subr.bf16.mxu0 %v5622_v20 }
0x1015   :  { %5625 = vmatpush3.bf16.msra.mxu0 %v5624_v23 }
0x10cb   :  { %v4836_v33 = vpop.f32.mrb[60].mxu0 }
0x10cc   :  { %v2477_v17 = vpop.f32.mrb[61].mxu0 }
0x10cd   :  { %2584 = vmatprep.mubr.f32.mxu0 %v2477_v17  ;;  %v3081_v17 = vld [vmem:[#allocation2 + $0x618] sm:$0xff] }
0x10ce   :  { %2585 = vmatmul.mubr.f32.vlgmr.msra.gmra.mrb[68].mxu0 %v6303_v10 }
0x10cf   :  { %v4839_v27 = vpop.f32.mrb[62].mxu0  ;;  %2589 = vmatprep.mubr.f32.mxu0 %v4836_v33 }
0x10d0   :  { %v2487_v19 = vpop.f32.mrb[63].mxu0 }
0x10d2   :  { %2590 = vmatmul.mubr.f32.gmra.mrb[70].mxu0 %v6300_v8 }
0x10d3   :  { %v4842_v28 = vpop.f32.mrb[64].mxu0  ;;  %2594 = vmatprep.mubr.f32.mxu0 %v2487_v19 }
0x10d4   :  { %v2497_v36 = vpop.f32.mrb[65].mxu0 }
0x10d5   :  { %4878 = vmatprep.mubr.f32.mxu1 %v2497_v36 }
0x10d6   :  { %2595 = vmatmul.mubr.f32.gmra.mrb[72].mxu0 %v6311_v31  ;;  %4879 = vmatmul.mubr.f32.vlgmr.msra.gmra.mrb[48].mxu1 %v4842_v28  ;;  %v3083_v28 = vld [vmem:[#allocation2 + $0x628] sm:$0xff] }
0x10d7   :  { %v4845_v44 = vpop.f32.mrb[66].mxu0  ;;  %2599 = vmatprep.mubr.f32.mxu0 %v4839_v27  ;;  %5669 = vmatpush3.bf16.msra.mxu1 %v6010_v38 }
0x10d8   :  { %v2507_v47 = vpop.f32.mrb[67].mxu0  ;;  %5671 = vmatprep.subr.bf16.mxu1 %v6012_v40 }
0x10d9   :  { %4881 = vmatprep.mubr.f32.mxu1 %v2507_v47  ;;  %v3085_v47 = vld [vmem:[#allocation2 + $0x638] sm:$0xff] }
0x10da   :  { %2600 = vmatmul.mubr.f32.gmra.mrb[74].mxu0 %v6308_v14  ;;  %4882 = vmatmul.mubr.f32.gmra.mrb[50].mxu1 %v4845_v44  ;;  %v3084_v44 = vld [vmem:[#allocation2 + $0x630] sm:$0xff] }
0x10db   :  { %4892 = vmatprep.mubr.msk.f32.mxu0 %vm109_vm0, %v6229_v63  ;;  %5673 = vmatpush3.bf16.msra.mxu1 %v6012_v40 }
0x10dc   :  { %5675 = vmatprep.subr.bf16.mxu1 %v6017_v43 }
0x10df   :  { %5677 = vmatpush3.bf16.msra.mxu1 %v6017_v43 }
0x10e0   :  { %5679 = vmatprep.subr.bf16.mxu1 %v6021_v46 }
0x10e3   :  { %5681 = vmatpush3.bf16.msra.mxu1 %v6021_v46 }
0x10e4   :  { %5683 = vmatprep.subr.bf16.mxu1 %v6025_v49 }
0x10e7   :  { %5685 = vmatpush3.bf16.msra.mxu1 %v6025_v49 }
0x10e8   :  { %5687 = vmatprep.subr.bf16.mxu1 %v6029_v52 }
0x10eb   :  { %5689 = vmatpush3.bf16.msra.mxu1 %v6029_v52 }
0x10ec   :  { %5691 = vmatprep.subr.bf16.mxu1 %v6033_v55 }
0x10ef   :  { %5693 = vmatpush3.bf16.msra.mxu1 %v6033_v55 }
0x10f0   :  { %5695 = vmatprep.subr.bf16.mxu1 %v6037_v58 }
0x10f3   :  { %5697 = vmatpush3.bf16.msra.mxu1 %v6037_v58 }
0x11a1   :  { %v4176_v8 = vpop.f32.mrb[68].mxu0 }
0x11a2   :  { %v4177_v10 = vpop.f32.mrb[69].mxu0 }
0x11a3   :  { %v4178_v14 = vadd.f32 %v4177_v10, %v4176_v8  ;;  %v5750_v8 = vpack.c.bf16 %v3085_v47, %v3084_v44  ;;  %v3086_v10 = vld [vmem:[#allocation2 + $0x640] sm:$0xff]  ;;  %v3095_v44 = vld [vmem:[#allocation2 + $0x708] sm:$0xff] }
0x11a5   :  { %v4179_v31 = vpop.f32.mrb[70].mxu0  ;;  %v2587_v48 = vadd.f32 %v4178_v14, %v3710_v45  ;;  %v3087_v14 = vld [vmem:[#allocation2 + $0x648] sm:$0xff] }
0x11a6   :  { %v4180_v42 = vpop.f32.mrb[71].mxu0 }
0x11a7   :  { %v4181_v50 = vadd.f32 %v4180_v42, %v4179_v31  ;;  %v5754_v31 = vpack.c.bf16 %v3087_v14, %v3086_v10  ;;  %v3088_v42 = vld [vmem:[#allocation2 + $0x650] sm:$0xff]  ;;  %v3097_v14 = vld [vmem:[#allocation2 + $0x718] sm:$0xff] }
0x11a8   :  { %v3096_v10 = vld [vmem:[#allocation2 + $0x710] sm:$0xff] }
0x11a9   :  { %v4182_v0 = vpop.f32.mrb[72].mxu0  ;;  %v2592_v53 = vadd.f32 %v4181_v50, %v3710_v45  ;;  %v4880_v54 = vpop.f32.mrb[48].mxu1 }
0x11aa   :  { %v4183_v59 = vpop.f32.mrb[73].mxu0  ;;  %v2671_v4 = vpop.f32.mrb[49].mxu1 }
0x11ab   :  { %v2677_v60 = vadd.f32 %v4880_v54, %v2592_v53  ;;  %v4184_v1 = vadd.f32 %v4183_v59, %v4182_v0  ;;  %v2672_v61 = vadd.f32 %v2671_v4, %v2587_v48  ;;  %v3090_v0 = vld [vmem:[#allocation2 + $0x660] sm:$0xff]  ;;  %v3091_v53 = vld [vmem:[#allocation2 + $0x668] sm:$0xff]  ;;  %v3092_v54 = vld [vmem:[#allocation2 + $0x670] sm:$0xff] }
0x11ac   :  { %v5762_v48 = vpack.c.bf16 %v3091_v53, %v3090_v0  ;;  %v3093_v59 = vld [vmem:[#allocation2 + $0x678] sm:$0xff]  ;;  %v3100_v0 = vld [vmem:[#allocation2 + $0x730] sm:$0xff] }
0x11ad   :  { %v5658_v2 = vpack.c.bf16 %v2677_v60, %v2672_v61  ;;  %v4185_v62 = vpop.f32.mrb[74].mxu0  ;;  %v4883_v3 = vpop.f32.mrb[50].mxu1  ;;  %v2597_v5 = vadd.f32 %v4184_v1, %v3710_v45  ;;  %v5766_v4 = vpack.c.bf16 %v3093_v59, %v3092_v54  ;;  %v3101_v53 = vld [vmem:[#allocation2 + $0x738] sm:$0xff]  ;;  %v3104_v59 = vld [vmem:[#allocation2 + $0x750] sm:$0xff] }
0x11ae   :  { %v4186_v39 = vpop.f32.mrb[75].mxu0  ;;  %v2681_v6 = vpop.f32.mrb[51].mxu1  ;;  %v5790_v54 = vpack.c.bf16 %v3101_v53, %v3100_v0 }
0x11af   :  { %v4187_v51 = vadd.f32 %v4186_v39, %v4185_v62  ;;  %v2682_v7 = vadd.f32 %v2681_v6, %v2597_v5  ;;  %5659 = vmatprep.subr.bf16.mxu0 %v5658_v2 }
0x11b0   :  { %5661 = vmatpush3.bf16.msra.mxu0 %v5658_v2 }
0x11b1   :  { %v2602_v9 = vadd.f32 %v4187_v51, %v3710_v45  ;;  %v3089_v45 = vld [vmem:[#allocation2 + $0x658] sm:$0xff]  ;;  %v3719_v51 = vld [vmem:[#allocation2 + $0x8ad] ss:$0 sm:$0xff] }
0x11b2   :  { %v5758_v50 = vpack.c.bf16 %v3089_v45, %v3088_v42  ;;  %v3098_v42 = vld [vmem:[#allocation2 + $0x720] sm:$0xff]  ;;  %v3099_v45 = vld [vmem:[#allocation2 + $0x728] sm:$0xff] }
0x11b3   :  { %v2687_v56 = vadd.f32 %v4883_v3, %v2602_v9 }
0x11b5   :  { %v5662_v57 = vpack.c.bf16 %v2687_v56, %v2682_v7 }
0x11b7   :  { %5663 = vmatprep.subr.bf16.mxu0 %v5662_v57 }
0x11b8   :  { %5665 = vmatpush3.bf16.msra.mxu0 %v5662_v57 }
0x11bb   :  { %4893 = vmatmul.mubr.msk.f32.vlgmr.msra.gmra.mrb[76].mxu0 %vm109_vm0, %v6242_v37 }
0x11bc   :  { %4895 = vmatprep.mubr.msk.f32.mxu0 %vm109_vm0, %v6246_v22 }
0x11bf   :  { %4896 = vmatmul.mubr.msk.f32.gmra.mrb[78].mxu0 %vm109_vm0, %v6250_v24 }
0x11c0   :  { %4944 = vmatprep.mubr.msk.f32.mxu0 %vm109_vm0, %v6229_v63 }
0x128e   :  { %v4894_v11 = vpop.f32.mrb[76].mxu0 }
0x128f   :  { %v2756_v12 = vpop.f32.mrb[77].mxu0 }
0x1290   :  { %4930 = vmatprep.mubr.f32.mxu1 %v2756_v12 }
0x1291   :  { %4931 = vmatmul.mubr.f32.vlgmr.msra.gmra.mrb[52].mxu1 %v4894_v11 }
0x1292   :  { %v4897_v13 = vpop.f32.mrb[78].mxu0 }
0x1293   :  { %v2766_v15 = vpop.f32.mrb[79].mxu0 }
0x1294   :  { %4933 = vmatprep.mubr.f32.mxu1 %v2766_v15 }
0x1295   :  { %4934 = vmatmul.mubr.f32.gmra.mrb[54].mxu1 %v4897_v13  ;;  %v3721_v13 = vld [vmem:[#allocation2 + $0x8af] ss:$0 sm:$0xff] }
0x1364   :  { %v4932_v16 = vpop.f32.mrb[52].mxu1 }
0x1365   :  { %v6352_v32 = vsub.f32 %v2677_v60, %v4932_v16  ;;  %v2841_v18 = vpop.f32.mrb[53].mxu1 }
0x1366   :  { %v6354_v20 = vsub.f32 %v2672_v61, %v2841_v18 }
0x1367   :  { %v2865_v34 = vmul.f32 %v6352_v32, %v6352_v32 }
0x1368   :  { %v2864_v21 = vmul.f32 %v6354_v20, %v6354_v20  ;;  %v4935_v23 = vpop.f32.mrb[54].mxu1 }
0x1369   :  { %v6360_v25 = vsub.f32 %v2687_v56, %v4935_v23  ;;  %v2851_v41 = vpop.f32.mrb[55].mxu1  ;;  %v3720_v56 = vld [vmem:[#allocation2 + $0x8ae] ss:$0 sm:$0xff] }
0x136a   :  { %v6362_v29 = vsub.f32 %v2682_v7, %v2851_v41  ;;  %v5698_v30 = vpack.c.bf16 %v2865_v34, %v2864_v21 }
0x136b   :  { %v2867_v35 = vmul.f32 %v6360_v25, %v6360_v25 }
0x136c   :  { %v2866_v26 = vmul.f32 %v6362_v29, %v6362_v29  ;;  %5699 = vmatprep.subr.bf16.mxu0 %v5698_v30 }
0x136d   :  { %5701 = vmatpush3.bf16.msra.mxu0 %v5698_v30 }
0x136e   :  { %v5702_v33 = vpack.c.bf16 %v2867_v35, %v2866_v26 }
0x1370   :  { %5703 = vmatprep.subr.bf16.mxu0 %v5702_v33 }
0x1371   :  { %5705 = vmatpush3.bf16.msra.mxu0 %v5702_v33 }
0x1372   :  { %5707 = vmatprep.subr.bf16.mxu0 %v6010_v38 }
0x1374   :  { %4945 = vmatmul.mubr.msk.f32.vlgmr.msra.gmra.mrb[80].mxu0 %vm109_vm0, %v6242_v37 }
0x1375   :  { %4947 = vmatprep.mubr.msk.f32.mxu0 %vm109_vm0, %v6246_v22  ;;  %5709 = vmatpush3.bf16.msra.mxu0 %v6010_v38  ;;  %v3078_v38 = vld [vmem:[#allocation2 + $0x600] sm:$0xff] }
0x1376   :  { %5711 = vmatprep.subr.bf16.mxu0 %v6012_v40 }
0x1378   :  { %4948 = vmatmul.mubr.msk.f32.gmra.mrb[82].mxu0 %vm109_vm0, %v6250_v24 }
0x1379   :  { %5713 = vmatpush3.bf16.msra.mxu0 %v6012_v40  ;;  %v3079_v40 = vld [vmem:[#allocation2 + $0x608] sm:$0xff] }
0x137a   :  { %5715 = vmatprep.subr.bf16.mxu0 %v6017_v43 }
0x137d   :  { %5717 = vmatpush3.bf16.msra.mxu0 %v6017_v43  ;;  %v3080_v43 = vld [vmem:[#allocation2 + $0x610] sm:$0xff] }
0x137e   :  { %5719 = vmatprep.subr.bf16.mxu0 %v6021_v46  ;;  %v5742_v27 = vpack.c.bf16 %v3081_v17, %v3080_v43 }
0x1381   :  { %5721 = vmatpush3.bf16.msra.mxu0 %v6021_v46  ;;  %v5738_v46 = vpack.c.bf16 %v3079_v40, %v3078_v38 }
0x1382   :  { %5723 = vmatprep.subr.bf16.mxu0 %v6025_v49 }
0x1383   :  { %5739 = vmatprep.subr.bf16.mxu1 %v5738_v46 }
0x1384   :  { %5741 = vmatpush3.bf16.msra.mxu1 %v5738_v46 }
0x1385   :  { %5725 = vmatpush3.bf16.msra.mxu0 %v6025_v49  ;;  %5743 = vmatprep.subr.bf16.mxu1 %v5742_v27 }
0x1386   :  { %5727 = vmatprep.subr.bf16.mxu0 %v6029_v52 }
0x1388   :  { %5745 = vmatpush3.bf16.msra.mxu1 %v5742_v27 }
0x1389   :  { %5729 = vmatpush3.bf16.msra.mxu0 %v6029_v52 }
0x138a   :  { %5731 = vmatprep.subr.bf16.mxu0 %v6033_v55 }
0x138d   :  { %5733 = vmatpush3.bf16.msra.mxu0 %v6033_v55 }
0x138e   :  { %5735 = vmatprep.subr.bf16.mxu0 %v6037_v58 }
0x1391   :  { %5737 = vmatpush3.bf16.msra.mxu0 %v6037_v58  ;;  %v3082_v58 = vld [vmem:[#allocation2 + $0x620] sm:$0xff] }
0x1392   :  { %v5746_v36 = vpack.c.bf16 %v3083_v28, %v3082_v58 }
0x1394   :  { %5747 = vmatprep.subr.bf16.mxu1 %v5746_v36 }
0x1395   :  { %5749 = vmatpush3.bf16.msra.mxu1 %v5746_v36  ;;  %v3094_v36 = vld [vmem:[#allocation2 + $0x700] sm:$0xff] }
0x1396   :  { %5751 = vmatprep.subr.bf16.mxu1 %v5750_v8 }
0x1399   :  { %5753 = vmatpush3.bf16.msra.mxu1 %v5750_v8  ;;  %v6410_v8 = vpack.c.bf16 %v3095_v44, %v3094_v36 }
0x139a   :  { %5755 = vmatprep.subr.bf16.mxu1 %v5754_v31 }
0x139d   :  { %5757 = vmatpush3.bf16.msra.mxu1 %v5754_v31  ;;  %v6413_v31 = vpack.c.bf16 %v3097_v14, %v3096_v10 }
0x139e   :  { %5759 = vmatprep.subr.bf16.mxu1 %v5758_v50 }
0x13a1   :  { %5761 = vmatpush3.bf16.msra.mxu1 %v5758_v50  ;;  %v6421_v50 = vpack.c.bf16 %v3099_v45, %v3098_v42 }
0x13a2   :  { %5763 = vmatprep.subr.bf16.mxu1 %v5762_v48 }
0x13a5   :  { %5765 = vmatpush3.bf16.msra.mxu1 %v5762_v48  ;;  %v3103_v48 = vld [vmem:[#allocation2 + $0x748] sm:$0xff] }
0x13a6   :  { %5767 = vmatprep.subr.bf16.mxu1 %v5766_v4 }
0x13a9   :  { %5769 = vmatpush3.bf16.msra.mxu1 %v5766_v4  ;;  %v3105_v4 = vld [vmem:[#allocation2 + $0x758] sm:$0xff] }
0x1447   :  { %v4946_v49 = vpop.f32.mrb[80].mxu0 }
0x1448   :  { %v2934_v52 = vpop.f32.mrb[81].mxu0 }
0x1449   :  { %4982 = vmatprep.mubr.f32.mxu0 %v2934_v52 }
0x144a   :  { %4983 = vmatmul.mubr.f32.vlgmr.msra.gmra.mrb[84].mxu0 %v4946_v49 }
0x144b   :  { %v4949_v19 = vpop.f32.mrb[82].mxu0 }
0x144c   :  { %v2944_v55 = vpop.f32.mrb[83].mxu0 }
0x144d   :  { %4985 = vmatprep.mubr.f32.mxu0 %v2944_v55 }
0x144e   :  { %4986 = vmatmul.mubr.f32.gmra.mrb[86].mxu0 %v4949_v19 }
0x144f   :  { %5034 = vmatprep.mubr.msk.f32.mxu0 %vm109_vm0, %v6229_v63 }
0x151d   :  { %v4984_v60 = vpop.f32.mrb[84].mxu0 }
0x151e   :  { %v3025_v1 = vadd.f32 1e-05, %v4984_v60  ;;  %v3019_v61 = vpop.f32.mrb[85].mxu0  ;;  %v5798_v60 = vpack.c.bf16 %v3105_v4, %v3104_v59 }
0x151f   :  { %v3020_v2 = vadd.f32 1e-05, %v3019_v61  ;;  %v3107_v61 = vld [vmem:[#allocation2 + $0x768] sm:$0xff] }
0x1520   :  { %5877 = vrsqrt.f32 %v3025_v1  ;;  %v3106_v1 = vld [vmem:[#allocation2 + $0x760] sm:$0xff] }
0x1521   :  { %5879 = vrsqrt.f32 %v3020_v2  ;;  %v4987_v62 = vpop.f32.mrb[86].mxu0  ;;  %v3108_v2 = vld [vmem:[#allocation2 + $0x770] sm:$0xff] }
0x1522   :  { %v3035_v3 = vadd.f32 1e-05, %v4987_v62  ;;  %v3029_v5 = vpop.f32.mrb[87].mxu0  ;;  %v3109_v62 = vld [vmem:[#allocation2 + $0x778] sm:$0xff] }
0x1523   :  { %v3030_v39 = vadd.f32 1e-05, %v3029_v5 }
0x1524   :  { %5881 = vrsqrt.f32 %v3035_v3  ;;  %v5806_v3 = vpack.c.bf16 %v3109_v62, %v3108_v2 }
0x1525   :  { %5883 = vrsqrt.f32 %v3030_v39 }
0x152a   :  { %v5878_v6 = vpop.eup %5877 }
0x152b   :  { %v5880_v7 = vpop.eup %5879  ;;  %v3043_v9 = vmul.f32 %v5878_v6, %v6352_v32 }
0x152c   :  { %v3042_v57 = vmul.f32 %v5880_v7, %v6354_v20 }
0x152d   :  { %v3051_v11 = vmul.f32 %v3719_v51, %v3043_v9 }
0x152e   :  { %v5882_v12 = vpop.eup %5881  ;;  %v3050_v15 = vmul.f32 %v3719_v51, %v3042_v57 }
0x152f   :  { %v5884_v16 = vpop.eup %5883  ;;  %v3059_v18 = vadd.f32 %v3720_v56, %v3051_v11  ;;  %v3045_v34 = vmul.f32 %v5882_v12, %v6360_v25 }
0x1530   :  { %v3058_v21 = vadd.f32 %v3720_v56, %v3050_v15  ;;  %v3044_v23 = vmul.f32 %v5884_v16, %v6362_v29  ;;  %v3722_v29 = vld [vmem:[#allocation2 + $0x8b0] ss:$0 sm:$0xff] }
0x1531   :  { %v3071_v41 = vmul.f32 %v3721_v13, %v3059_v18  ;;  %v3053_v30 = vmul.f32 %v3719_v51, %v3045_v34  ;;  %vm3063_vm14 = vcmp.ge.f32.partialorder %v3059_v18, 0.0 }
0x1532   :  { %vm3062_vm13 = vcmp.ge.f32.partialorder %v3058_v21, 0.0  ;;  %v3070_v35 = vmul.f32 %v3721_v13, %v3058_v21  ;;  %v3052_v32 = vmul.f32 %v3719_v51, %v3044_v23 }
0x1533   :  { %v3061_v26 = vadd.f32 %v3720_v56, %v3053_v30  ;;  %v3075_v38 = vsel %vm3063_vm14, %v3059_v18, %v3071_v41  ;;  %v5913_v30 = vld [vmem:[#allocation2 + $0x788] sm:$0xff] }
0x1534   :  { %v3074_v33 = vsel %vm3062_vm13, %v3058_v21, %v3070_v35  ;;  %v3060_v20 = vadd.f32 %v3720_v56, %v3052_v32  ;;  %v5914_v35 = vld [vmem:[#allocation2 + $0x790] sm:$0xff]  ;;  %v5915_v32 = vld [vmem:[#allocation2 + $0x798] sm:$0xff] }
0x1535   :  { %5020 = vmatprep.mubr.f32.mxu1 %v3074_v33  ;;  %v3073_v40 = vmul.f32 %v3721_v13, %v3061_v26  ;;  %vm3065_vm1 = vcmp.ge.f32.partialorder %v3061_v26, 0.0 }
0x1536   :  { %5021 = vmatmul.mubr.f32.vlgmr.msra.gmra.mrb[56].mxu1 %v3075_v38  ;;  %vm3064_vm15 = vcmp.ge.f32.partialorder %v3060_v20, 0.0  ;;  %v3072_v43 = vmul.f32 %v3721_v13, %v3060_v20 }
0x1537   :  { %v3077_v46 = vsel %vm3065_vm1, %v3061_v26, %v3073_v40 }
0x1538   :  { %v3076_v25 = vsel %vm3064_vm15, %v3060_v20, %v3072_v43 }
0x1539   :  { %5023 = vmatprep.mubr.f32.mxu1 %v3076_v25 }
0x153a   :  { %5024 = vmatmul.mubr.f32.gmra.mrb[58].mxu1 %v3077_v46 }
0x153b   :  { %5086 = vmatprep.mubr.msk.f32.mxu1 %vm109_vm0, %v6229_v63 }
0x1609   :  { %v5022_v17 = vpop.f32.mrb[56].mxu1 }
0x160a   :  { %v6398_v27 = vadd.f32 %v5022_v17, %v3722_v29  ;;  %v3186_v49 = vpop.f32.mrb[57].mxu1 }
0x160b   :  { %v6400_v52 = vadd.f32 %v3722_v29, %v3186_v49 }
0x160d   :  { %v5770_v19 = vpack.c.bf16 %v6398_v27, %v6400_v52  ;;  %v5025_v55 = vpop.f32.mrb[58].mxu1 }
0x160e   :  { %v6404_v58 = vadd.f32 %v5025_v55, %v3722_v29  ;;  %v3196_v28 = vpop.f32.mrb[59].mxu1 }
0x160f   :  { %v6406_v47 = vadd.f32 %v3722_v29, %v3196_v28  ;;  %5771 = vmatprep.subr.bf16.mxu0 %v5770_v19  ;;  %v3732_v28 = vld [vmem:[#allocation2 + $0x8b2] ss:$0 sm:$0xff] }
0x1610   :  { %5773 = vmatpush3.bf16.msra.mxu0 %v5770_v19  ;;  %v3731_v19 = vld [vmem:[#allocation2 + $0x8b1] ss:$0 sm:$0xff] }
0x1611   :  { %v5774_v63 = vpack.c.bf16 %v6404_v58, %v6406_v47 }
0x1613   :  { %5775 = vmatprep.subr.bf16.mxu0 %v5774_v63 }
0x1614   :  { %5777 = vmatpush3.bf16.msra.mxu0 %v5774_v63  ;;  %v3733_v63 = vld [vmem:[#allocation2 + $0x8b3] ss:$0 sm:$0xff] }
0x1615   :  { %5779 = vmatprep.subr.bf16.mxu0 %v6410_v8 }
0x1617   :  { %5035 = vmatmul.mubr.msk.f32.vlgmr.msra.gmra.mrb[88].mxu0 %vm109_vm0, %v6242_v37  ;;  %v3102_v37 = vld [vmem:[#allocation2 + $0x740] sm:$0xff] }
0x1618   :  { %5037 = vmatprep.mubr.msk.f32.mxu0 %vm109_vm0, %v6246_v22  ;;  %5781 = vmatpush3.bf16.msra.mxu0 %v6410_v8  ;;  %v5794_v22 = vpack.c.bf16 %v3103_v48, %v3102_v37  ;;  %v3735_v48 = vld [vmem:[#allocation2 + $0x8b5] ss:$0 sm:$0xff] }
0x1619   :  { %5783 = vmatprep.subr.bf16.mxu0 %v6413_v31 }
0x161b   :  { %5038 = vmatmul.mubr.msk.f32.gmra.mrb[90].mxu0 %vm109_vm0, %v6250_v24  ;;  %v5802_v24 = vpack.c.bf16 %v3107_v61, %v3106_v1 }
0x161c   :  { %5785 = vmatpush3.bf16.msra.mxu0 %v6413_v31 }
0x161d   :  { %5787 = vmatprep.subr.bf16.mxu0 %v6421_v50 }
0x1620   :  { %5789 = vmatpush3.bf16.msra.mxu0 %v6421_v50 }
0x1621   :  { %5791 = vmatprep.subr.bf16.mxu0 %v5790_v54 }
0x1624   :  { %5793 = vmatpush3.bf16.msra.mxu0 %v5790_v54 }
0x1625   :  { %5795 = vmatprep.subr.bf16.mxu0 %v5794_v22 }
0x1628   :  { %5797 = vmatpush3.bf16.msra.mxu0 %v5794_v22 }
0x1629   :  { %5799 = vmatprep.subr.bf16.mxu0 %v5798_v60 }
0x162c   :  { %5801 = vmatpush3.bf16.msra.mxu0 %v5798_v60 }
0x162d   :  { %5803 = vmatprep.subr.bf16.mxu0 %v5802_v24 }
0x1630   :  { %5805 = vmatpush3.bf16.msra.mxu0 %v5802_v24 }
0x1631   :  { %5807 = vmatprep.subr.bf16.mxu0 %v5806_v3 }
0x1634   :  { %5809 = vmatpush3.bf16.msra.mxu0 %v5806_v3 }
0x16ea   :  { %v5036_v5 = vpop.f32.mrb[88].mxu0 }
0x16eb   :  { %v3271_v39 = vpop.f32.mrb[89].mxu0 }
0x16ec   :  { %5072 = vmatprep.mubr.f32.mxu0 %v3271_v39 }
0x16ed   :  { %5073 = vmatmul.mubr.f32.vlgmr.msra.gmra.mrb[92].mxu0 %v5036_v5 }
0x16ee   :  { %v5039_v6 = vpop.f32.mrb[90].mxu0 }
0x16ef   :  { %v3281_v51 = vpop.f32.mrb[91].mxu0 }
0x16f0   :  { %5075 = vmatprep.mubr.f32.mxu0 %v3281_v51 }
0x16f1   :  { %5076 = vmatmul.mubr.f32.gmra.mrb[94].mxu0 %v5039_v6 }
0x17c0   :  { %v5074_v7 = vpop.f32.mrb[92].mxu0 }
0x17c1   :  { %v3376_v9 = vsub.f32 %v6398_v27, %v5074_v7  ;;  %v3356_v56 = vpop.f32.mrb[93].mxu0 }
0x17c2   :  { %v3375_v57 = vsub.f32 %v6400_v52, %v3356_v56 }
0x17c3   :  { %v3380_v11 = vmul.f32 %v3376_v9, %v3376_v9 }
0x17c4   :  { %v3379_v12 = vmul.f32 %v3375_v57, %v3375_v57  ;;  %v5077_v13 = vpop.f32.mrb[94].mxu0 }
0x17c5   :  { %v6431_v15 = vsub.f32 %v6404_v58, %v5077_v13  ;;  %v3366_v16 = vpop.f32.mrb[95].mxu0 }
0x17c6   :  { %v6434_v18 = vsub.f32 %v6406_v47, %v3366_v16  ;;  %v5810_v34 = vpack.c.bf16 %v3380_v11, %v3379_v12 }
0x17c7   :  { %v3382_v21 = vmul.f32 %v6431_v15, %v6431_v15 }
0x17c8   :  { %v3381_v23 = vmul.f32 %v6434_v18, %v6434_v18  ;;  %5811 = vmatprep.subr.bf16.mxu1 %v5810_v34 }
0x17c9   :  { %5813 = vmatpush3.bf16.msra.mxu1 %v5810_v34 }
0x17ca   :  { %v5814_v41 = vpack.c.bf16 %v3382_v21, %v3381_v23 }
0x17cc   :  { %5815 = vmatprep.subr.bf16.mxu1 %v5814_v41 }
0x17cd   :  { %5817 = vmatpush3.bf16.msra.mxu1 %v5814_v41 }
0x17ce   :  { %5819 = vmatprep.subr.bf16.mxu1 %v6410_v8 }
0x17d0   :  { %5087 = vmatmul.mubr.msk.f32.vlgmr.msra.gmra.mrb[60].mxu1 %vm109_vm0, %v5913_v30 }
0x17d1   :  { %5089 = vmatprep.mubr.msk.f32.mxu1 %vm109_vm0, %v5914_v35  ;;  %5821 = vmatpush3.bf16.msra.mxu1 %v6410_v8 }
0x17d2   :  { %5823 = vmatprep.subr.bf16.mxu1 %v6413_v31 }
0x17d4   :  { %5090 = vmatmul.mubr.msk.f32.gmra.mrb[62].mxu1 %vm109_vm0, %v5915_v32 }
0x17d5   :  { %5825 = vmatpush3.bf16.msra.mxu1 %v6413_v31 }
0x17d6   :  { %5827 = vmatprep.subr.bf16.mxu1 %v6421_v50 }
0x17d9   :  { %5829 = vmatpush3.bf16.msra.mxu1 %v6421_v50  ;;  %v3734_v50 = vld [vmem:[#allocation2 + $0x8b4] ss:$0 sm:$0xff] }
0x17da   :  { %5831 = vmatprep.subr.bf16.mxu1 %v5790_v54 }
0x17dd   :  { %5833 = vmatpush3.bf16.msra.mxu1 %v5790_v54 }
0x17de   :  { %5835 = vmatprep.subr.bf16.mxu1 %v5794_v22 }
0x17e1   :  { %5837 = vmatpush3.bf16.msra.mxu1 %v5794_v22 }
0x17e2   :  { %5839 = vmatprep.subr.bf16.mxu1 %v5798_v60 }
0x17e5   :  { %5841 = vmatpush3.bf16.msra.mxu1 %v5798_v60 }
0x17e6   :  { %5843 = vmatprep.subr.bf16.mxu1 %v5802_v24 }
0x17e9   :  { %5845 = vmatpush3.bf16.msra.mxu1 %v5802_v24 }
0x17ea   :  { %5847 = vmatprep.subr.bf16.mxu1 %v5806_v3 }
0x17ed   :  { %5849 = vmatpush3.bf16.msra.mxu1 %v5806_v3 }
0x18a3   :  { %v5088_v26 = vpop.f32.mrb[60].mxu1 }
0x18a4   :  { %v3449_v33 = vpop.f32.mrb[61].mxu1 }
0x18a5   :  { %5124 = vmatprep.mubr.f32.mxu1 %v3449_v33 }
0x18a6   :  { %5125 = vmatmul.mubr.f32.vlgmr.msra.gmra.mrb[64].mxu1 %v5088_v26 }
0x18a7   :  { %v5091_v20 = vpop.f32.mrb[62].mxu1 }
0x18a8   :  { %v3459_v38 = vpop.f32.mrb[63].mxu1 }
0x18a9   :  { %5127 = vmatprep.mubr.f32.mxu1 %v3459_v38 }
0x18aa   :  { %5128 = vmatmul.mubr.f32.gmra.mrb[66].mxu1 %v5091_v20 }
0x1979   :  { %v5126_v40 = vpop.f32.mrb[64].mxu1 }
0x197a   :  { %v3540_v43 = vadd.f32 1e-05, %v5126_v40  ;;  %v3534_v25 = vpop.f32.mrb[65].mxu1 }
0x197b   :  { %v3535_v46 = vadd.f32 1e-05, %v3534_v25 }
0x197c   :  { %5885 = vrsqrt.f32 %v3540_v43 }
0x197d   :  { %5887 = vrsqrt.f32 %v3535_v46  ;;  %v5129_v29 = vpop.f32.mrb[66].mxu1 }
0x197e   :  { %v3550_v17 = vadd.f32 1e-05, %v5129_v29  ;;  %v3544_v27 = vpop.f32.mrb[67].mxu1 }
0x197f   :  { %v3545_v49 = vadd.f32 1e-05, %v3544_v27 }
0x1980   :  { %5889 = vrsqrt.f32 %v3550_v17 }
0x1981   :  { %5891 = vrsqrt.f32 %v3545_v49 }
0x1986   :  { %v5886_v52 = vpop.eup %5885 }
0x1987   :  { %v5888_v55 = vpop.eup %5887  ;;  %v3558_v58 = vmul.f32 %v5886_v52, %v3376_v9 }
0x1988   :  { %v3557_v36 = vmul.f32 %v5888_v55, %v3375_v57 }
0x1989   :  { %v3566_v44 = vmul.f32 %v3731_v19, %v3558_v58 }
0x198a   :  { %v5890_v47 = vpop.eup %5889  ;;  %v3565_v8 = vmul.f32 %v3731_v19, %v3557_v36 }
0x198b   :  { %v5892_v10 = vpop.eup %5891  ;;  %v3574_v14 = vadd.f32 %v3732_v28, %v3566_v44  ;;  %v3560_v31 = vmul.f32 %v5890_v47, %v6431_v15 }
0x198c   :  { %v3573_v42 = vadd.f32 %v3732_v28, %v3565_v8  ;;  %v3559_v45 = vmul.f32 %v5892_v10, %v6434_v18 }
0x198d   :  { %vm3578_vm0 = vcmp.ge.f32.partialorder %v3574_v14, 0.0  ;;  %v3586_v0 = vmul.f32 %v3733_v63, %v3574_v14  ;;  %v3568_v53 = vmul.f32 %v3731_v19, %v3560_v31 }
0x198e   :  { %vm3577_vm2 = vcmp.ge.f32.partialorder %v3573_v42, 0.0  ;;  %v3585_v54 = vmul.f32 %v3733_v63, %v3573_v42  ;;  %v3567_v37 = vmul.f32 %v3731_v19, %v3559_v45 }
0x198f   :  { %v3590_v22 = vsel %vm3578_vm0, %v3574_v14, %v3586_v0  ;;  %v3576_v59 = vadd.f32 %v3732_v28, %v3568_v53 }
0x1990   :  { %v3598_v4 = vmul.f32 %v3734_v50, %v3590_v22  ;;  %v3589_v60 = vsel %vm3577_vm2, %v3573_v42, %v3585_v54  ;;  %v3575_v1 = vadd.f32 %v3732_v28, %v3567_v37 }
0x1991   :  { %v3597_v61 = vmul.f32 %v3734_v50, %v3589_v60  ;;  %vm3580_vm3 = vcmp.ge.f32.partialorder %v3576_v59, 0.0  ;;  %v3588_v24 = vmul.f32 %v3733_v63, %v3576_v59 }
0x1992   :  { %v3606_v2 = vadd.f32 %v3735_v48, %v3598_v4  ;;  %vm3579_vm4 = vcmp.ge.f32.partialorder %v3575_v1, 0.0  ;;  %v3587_v62 = vmul.f32 %v3733_v63, %v3575_v1 }
0x1993   :  { %v3605_v3 = vadd.f32 %v3735_v48, %v3597_v61  ;;  %v3592_v5 = vsel %vm3580_vm3, %v3576_v59, %v3588_v24 }
0x1994   :  { %v3610_v39 = vsub.f32 0.0, %v3606_v2  ;;  %v3600_v6 = vmul.f32 %v3734_v50, %v3592_v5  ;;  %v3591_v51 = vsel %vm3579_vm4, %v3575_v1, %v3587_v62 }
0x1995   :  { %v3609_v7 = vsub.f32 0.0, %v3605_v3  ;;  %v3599_v9 = vmul.f32 %v3734_v50, %v3591_v51 }
0x1996   :  { %v3615_v56 = vmul.f32 1.442695, %v3610_v39  ;;  %v3608_v57 = vadd.f32 %v3735_v48, %v3600_v6 }
0x1997   :  { %v3613_v11 = vmul.f32 1.442695, %v3609_v7  ;;  %v3607_v12 = vadd.f32 %v3735_v48, %v3599_v9 }
0x1998   :  { %5893 = vpow2.f32 %v3615_v56  ;;  %v3612_v13 = vsub.f32 0.0, %v3608_v57 }
0x1999   :  { %5895 = vpow2.f32 %v3613_v11  ;;  %v3611_v15 = vsub.f32 0.0, %v3607_v12 }
0x199a   :  { %v3619_v16 = vmul.f32 1.442695, %v3612_v13 }
0x199b   :  { %v3617_v18 = vmul.f32 1.442695, %v3611_v15 }
0x199c   :  { %5897 = vpow2.f32 %v3619_v16 }
0x199d   :  { %5899 = vpow2.f32 %v3617_v18 }
0x19a2   :  { %v5894_v34 = vpop.eup %5893 }
0x19a3   :  { %v5896_v21 = vpop.eup %5895  ;;  %v3622_v23 = vadd.f32 1.0, %v5894_v34 }
0x19a4   :  { %v3621_v41 = vadd.f32 1.0, %v5896_v21 }
0x19a5   :  { %5901 = vrcp.f32 %v3622_v23 }
0x19a6   :  { %v5898_v30 = vpop.eup %5897  ;;  %5903 = vrcp.f32 %v3621_v41 }
0x19a7   :  { %v5900_v35 = vpop.eup %5899  ;;  %v3624_v32 = vadd.f32 1.0, %v5898_v30 }
0x19a8   :  { %v3623_v26 = vadd.f32 1.0, %v5900_v35 }
0x19a9   :  { %5905 = vrcp.f32 %v3624_v32 }
0x19aa   :  { %5907 = vrcp.f32 %v3623_v26 }
0x19af   :  { %v5902_v33 = vpop.eup %5901 }
0x19b0   :  { %v5904_v20 = vpop.eup %5903  ;;  %v3630_v38 = vmul.f32 2.0, %v5902_v33 }
0x19b1   :  { %v3629_v40 = vmul.f32 2.0, %v5904_v20 }
0x19b2   :  { %3634 = vst [vmem:[%s6465_s2 + $0x8] sm:$0xff] %v3630_v38 }
0x19b3   :  { %v5906_v43 = vpop.eup %5905  ;;  %3633 = vst [vmem:[%s6465_s2] sm:$0xff] %v3629_v40 }
0x19b4   :  { %v5908_v25 = vpop.eup %5907  ;;  %v3632_v46 = vmul.f32 2.0, %v5906_v43 }
0x19b5   :  { %v3631_v29 = vmul.f32 2.0, %v5908_v25 }
0x19b6   :  { %3636 = vst [vmem:[%s6465_s2 + $0x18] sm:$0xff] %v3632_v46 }
0x19b7   :  { %3635 = vst [vmem:[%s6465_s2 + $0x10] sm:$0xff] %v3631_v29 }
0x19b8   :  { %3641 = vsyncpa [#allocation3], 1 }

</bundles_post_ra>
